<compile_context>
chip_gen: v7x
topology: tpu7x:2x2x1
jax: 0.10.0
libtpu: 0.0.40
codegen_flags: <defaults>
</compile_context>

<pallas_src>
import functools

import jax
import jax.numpy as jnp
from jax import lax
from jax.experimental import pallas as pl
from jax.experimental.pallas import tpu as pltpu


def _round_up(x, m):
    return ((x + m - 1) // m) * m


# --------------------------------------------------------------------------
# Pallas kernel
# --------------------------------------------------------------------------
def _encoder_lstm_kernel(len_ref, emb_ref, wx_ref, bx_ref, whh_ref,
                         h0_ref, c0_ref, out_ref, hn_ref, cn_ref, gx_ref):
    T, TB, EP = emb_ref.shape
    HHP = h0_ref.shape[2]          # lane-padded hidden size (multiple of 128)
    G = 4 * HHP                    # gate width per direction

    # ---- hoisted input projection: ONE dense MXU matmul for both directions.
    x = emb_ref[...].reshape(T * TB, EP)
    gx = jnp.dot(x, wx_ref[...], preferred_element_type=jnp.float32) + bx_ref[...]
    gx_ref[...] = gx.reshape(T, TB, 2 * G).astype(gx_ref.dtype)

    whh = whh_ref[...]             # (2*HHP, 2*G) block-diag [fwd | bwd]
    lengths = len_ref[...]         # (TB, 1) int32

    def gate_sig(v):
        # exact: sigmoid(x) = 0.5 * tanh(0.5 x) + 0.5  (1 EUP push instead of 2)
        return 0.5 * jnp.tanh(0.5 * v) + 0.5

    def cell(gates, c):
        # Gate columns are 128-aligned blocks (i, f, g, o), PyTorch order.
        i = gate_sig(gates[:, 0 * HHP:1 * HHP])
        f = gate_sig(gates[:, 1 * HHP:2 * HHP])
        g = jnp.tanh(gates[:, 2 * HHP:3 * HHP])
        o = gate_sig(gates[:, 3 * HHP:4 * HHP])
        c_new = f * c + i * g
        return o * jnp.tanh(c_new), c_new

    def body(t, carry):
        hf, cf, hb, cb = carry
        tt = T - 1 - t
        m_f = lengths > t          # (TB, 1) bool, built in-kernel (no mask DMA)
        m_b = lengths > tt

        # -- fused recurrent matmul for BOTH directions: K = 2*HHP.
        h_cat = jnp.concatenate([hf, hb], axis=-1).astype(whh.dtype)   # (TB, 2*HHP)
        g_rec = jnp.dot(h_cat, whh, preferred_element_type=jnp.float32)  # (TB, 2*G)

        g_f = gx_ref[t, :, 0:G].astype(jnp.float32) + g_rec[:, 0:G]
        g_b = gx_ref[tt, :, G:2 * G].astype(jnp.float32) + g_rec[:, G:2 * G]

        hf_new, cf_new = cell(g_f, cf)
        hb_new, cb_new = cell(g_b, cb)

        out_ref[t, :, 0:HHP] = jnp.where(m_f, hf_new, 0.0).astype(out_ref.dtype)
        out_ref[tt, :, HHP:2 * HHP] = jnp.where(m_b, hb_new, 0.0).astype(out_ref.dtype)

        hf = jnp.where(m_f, hf_new, hf)        # freeze past sequence length
        cf = jnp.where(m_f, cf_new, cf)
        hb = jnp.where(m_b, hb_new, hb)
        cb = jnp.where(m_b, cb_new, cb)
        return hf, cf, hb, cb

    hf, cf, hb, cb = lax.fori_loop(
        0, T, body, (h0_ref[0], c0_ref[0], h0_ref[1], c0_ref[1]))
    hn_ref[0] = hf
    cn_ref[0] = cf
    hn_ref[1] = hb
    cn_ref[1] = cb


# --------------------------------------------------------------------------
# Parameter init / weight layout helpers
# --------------------------------------------------------------------------
def init_encoder_params(key, input_size, embed_size, hidden_size):
    hh = hidden_size // 2
    ks = jax.random.split(key, 9)
    bound = 1.0 / (hh ** 0.5)

    def u(k, shape):
        return jax.random.uniform(k, shape, jnp.float32, -bound, bound)

    return dict(
        embedding=jax.random.normal(ks[0], (input_size, embed_size), jnp.float32),
        w_ih_f=u(ks[1], (4 * hh, embed_size)),
        w_hh_f=u(ks[2], (4 * hh, hh)),
        b_ih_f=u(ks[3], (4 * hh,)),
        b_hh_f=u(ks[4], (4 * hh,)),
        w_ih_b=u(ks[5], (4 * hh, embed_size)),
        w_hh_b=u(ks[6], (4 * hh, hh)),
        b_ih_b=u(ks[7], (4 * hh,)),
        b_hh_b=u(ks[8], (4 * hh,)),
    )


def _pad_gate_cols(w_t, in_pad, hh, hhp):
    """(in_dim, 4*hh) -> (in_pad, 4*hhp): each gate block lane-padded with zeros."""
    in_dim = w_t.shape[0]
    out = jnp.zeros((in_pad, 4 * hhp), w_t.dtype)
    for k in range(4):
        out = out.at[:in_dim, k * hhp:k * hhp + hh].set(w_t[:, k * hh:(k + 1) * hh])
    return out


def _pad_gate_bias(b, hh, hhp):
    out = jnp.zeros((1, 4 * hhp), b.dtype)
    for k in range(4):
        out = out.at[0, k * hhp:k * hhp + hh].set(b[k * hh:(k + 1) * hh])
    return out


# --------------------------------------------------------------------------
# Wrapper
# --------------------------------------------------------------------------
@functools.partial(jax.jit, static_argnames=("compute_dtype", "out_dtype"))
def encoder_forward(params, input_ids, lengths, hidden,
                    compute_dtype=jnp.bfloat16, out_dtype=jnp.float32):
    B, T = input_ids.shape
    hh = params["w_hh_f"].shape[1]
    V, E = params["embedding"].shape
    HHP = _round_up(hh, 128)          # lane-padded hidden
    EP = _round_up(E, 128)            # lane-padded embed
    G = 4 * HHP

    # Batch tile: as large as practical (MXU fill + grid-overhead amortization),
    # capped at 64 to keep the carried (TB, HHP) f32 states within vreg budget.
    # TODO(synk): on v7x, ensure nb >= 2 (or add a fwd/bwd grid axis) so both
    # TensorCores are used when the batch fits in a single tile.
    TB = min(64, _round_up(max(B, 1), 8))
    BP = _round_up(B, TB)
    nb = BP // TB

    # ---- fused embedding gather: ONE gather directly producing the padded,
    # time-major, compute-dtype buffer (table lane-padded once, ids transposed).
    emb_table = jnp.zeros((V, EP), jnp.float32).at[:, :E].set(params["embedding"])
    emb_table = emb_table.astype(compute_dtype)
    ids_tm = jnp.zeros((T, BP), jnp.int32).at[:, :B].set(
        input_ids.astype(jnp.int32).T)
    emb = jnp.take(emb_table, ids_tm, axis=0)                      # (T, BP, EP)

    # Fused, gate-column-padded input-projection matrix (both directions), and
    # a block-diagonal recurrent matrix for the fused per-step matmul.  Padded
    # columns/rows are zero, so padded state lanes stay exactly zero.
    w_x = jnp.concatenate(
        [_pad_gate_cols(params["w_ih_f"].T, EP, hh, HHP),
         _pad_gate_cols(params["w_ih_b"].T, EP, hh, HHP)],
        axis=1).astype(compute_dtype)                              # (EP, 2*G)
    b_x = jnp.concatenate(
        [_pad_gate_bias(params["b_ih_f"] + params["b_hh_f"], hh, HHP),
         _pad_gate_bias(params["b_ih_b"] + params["b_hh_b"], hh, HHP)],
        axis=1)                                                    # (1, 2*G) f32
    whh_f = _pad_gate_cols(params["w_hh_f"].T, HHP, hh, HHP)
    whh_b = _pad_gate_cols(params["w_hh_b"].T, HHP, hh, HHP)
    w_hh = (jnp.zeros((2 * HHP, 2 * G), jnp.float32)
            .at[:HHP, :G].set(whh_f)
            .at[HHP:, G:].set(whh_b)).astype(compute_dtype)        # block-diag

    h0, c0 = hidden                                                # (2, B, hh)
    h0p = jnp.zeros((2, BP, HHP), jnp.float32).at[:, :B, :hh].set(h0)
    c0p = jnp.zeros((2, BP, HHP), jnp.float32).at[:, :B, :hh].set(c0)

    # Padded batch rows get length 0 -> always masked, state frozen at zero.
    len_p = jnp.zeros((BP, 1), jnp.int32).at[:B, 0].set(lengths.astype(jnp.int32))

    # ---- VMEM budget: actual footprint + headroom, clamped to HW capacity.
    cd_b = jnp.dtype(compute_dtype).itemsize
    out_b = jnp.dtype(out_dtype).itemsize
    footprint = (T * TB * 2 * G * cd_b                     # gx scratch
                 + 2 * T * TB * EP * cd_b                  # emb (double-buffered)
                 + 2 * T * TB * 2 * HHP * out_b            # out (double-buffered)
                 + 2 * (EP * 2 * G + 2 * HHP * 2 * G + 2 * G) * cd_b   # weights
                 + 2 * 6 * 2 * TB * HHP * 4)               # h0/c0/hn/cn blocks
    vmem_limit = max(32 * 1024 * 1024, int(footprint * 1.25) + (4 << 20))
    try:
        cap = int(pltpu.get_tpu_info().vmem_capacity_bytes)
    except Exception:
        cap = 128 * 1024 * 1024
    vmem_limit = min(vmem_limit, int(cap * 0.85))

    in_specs = [
        pl.BlockSpec((TB, 1), lambda b: (b, 0)),                   # lengths
        pl.BlockSpec((T, TB, EP), lambda b: (0, b, 0)),            # emb
        pl.BlockSpec((EP, 2 * G), lambda b: (0, 0)),               # w_x
        pl.BlockSpec((1, 2 * G), lambda b: (0, 0)),                # b_x
        pl.BlockSpec((2 * HHP, 2 * G), lambda b: (0, 0)),          # w_hh (block-diag)
        pl.BlockSpec((2, TB, HHP), lambda b: (0, b, 0)),           # h0
        pl.BlockSpec((2, TB, HHP), lambda b: (0, b, 0)),           # c0
    ]
    out_specs = [
        pl.BlockSpec((T, TB, 2 * HHP), lambda b: (0, b, 0)),       # out [fwd|bwd]
        pl.BlockSpec((2, TB, HHP), lambda b: (0, b, 0)),           # h_n
        pl.BlockSpec((2, TB, HHP), lambda b: (0, b, 0)),           # c_n
    ]
    out_shapes = (
        jax.ShapeDtypeStruct((T, BP, 2 * HHP), out_dtype),
        jax.ShapeDtypeStruct((2, BP, HHP), jnp.float32),
        jax.ShapeDtypeStruct((2, BP, HHP), jnp.float32),
    )

    out, hn, cn = pl.pallas_call(
        _encoder_lstm_kernel,
        out_shape=out_shapes,
        grid_spec=pltpu.PrefetchScalarGridSpec(
            num_scalar_prefetch=0,
            grid=(nb,),
            in_specs=in_specs,
            out_specs=out_specs,
            scratch_shapes=[pltpu.VMEM((T, TB, 2 * G), compute_dtype)]),
        compiler_params=pltpu.CompilerParams(
            dimension_semantics=("parallel",),
            vmem_limit_bytes=vmem_limit),
    )(len_p, emb, w_x, b_x, w_hh, h0p, c0p)

    # Strip padding; combine directions (PyTorch layout: [fwd | bwd]).
    output = jnp.concatenate([out[:, :B, :hh], out[:, :B, HHP:HHP + hh]], axis=-1)
    output = jnp.transpose(output, (1, 0, 2))                      # (B, T, hidden)
    return output, (hn[:, :B, :hh], cn[:, :B, :hh])


# --------------------------------------------------------------------------
# Pure-JAX reference (packed-sequence semantics via masking)
# --------------------------------------------------------------------------
def encoder_forward_ref(params, input_ids, lengths, hidden):
    B, T = input_ids.shape
    emb = jnp.take(params["embedding"], input_ids, axis=0)          # (B, T, E)
    mask = (jnp.arange(T)[None, :] < lengths[:, None]).astype(jnp.float32)
    h0, c0 = hidden

    def cell(x, h, c, w_ih, w_hh, b_ih, b_hh):
        g = x @ w_ih.T + b_ih + h @ w_hh.T + b_hh
        i, f, gg, o = jnp.split(g, 4, axis=-1)
        c_new = jax.nn.sigmoid(f) * c + jax.nn.sigmoid(i) * jnp.tanh(gg)
        h_new = jax.nn.sigmoid(o) * jnp.tanh(c_new)
        return h_new, c_new

    h, c = h0[0], c0[0]
    outs_f = []
    for t in range(T):
        m = mask[:, t:t + 1]
        hn_, cn_ = cell(emb[:, t], h, c, params["w_ih_f"], params["w_hh_f"],
                        params["b_ih_f"], params["b_hh_f"])
        outs_f.append(m * hn_)
        h = m * hn_ + (1 - m) * h
        c = m * cn_ + (1 - m) * c
    hN_f, cN_f = h, c

    h, c = h0[1], c0[1]
    outs_b = [None] * T
    for t in range(T - 1, -1, -1):
        m = mask[:, t:t + 1]
        hn_, cn_ = cell(emb[:, t], h, c, params["w_ih_b"], params["w_hh_b"],
                        params["b_ih_b"], params["b_hh_b"])
        outs_b[t] = m * hn_
        h = m * hn_ + (1 - m) * h
        c = m * cn_ + (1 - m) * c
    hN_b, cN_b = h, c

    out = jnp.concatenate([jnp.stack(outs_f, 1), jnp.stack(outs_b, 1)], axis=-1)
    return out, (jnp.stack([hN_f, hN_b], 0), jnp.stack([cN_f, cN_b], 0))


if __name__ == "__main__":
    input_size, embed_size, hidden_size = 20, 16, 32
    B, T = 2, 8
    hh = hidden_size // 2

    key = jax.random.PRNGKey(0)
    k_params, k_ids = jax.random.split(key)
    params = init_encoder_params(k_params, input_size, embed_size, hidden_size)

    input_ids = jax.random.randint(k_ids, (B, T), 0, input_size, dtype=jnp.int32)
    lengths = jnp.array([8, 5], dtype=jnp.int32)   # sorted decreasing (pack_padded req.)
    hidden = (jnp.zeros((2, B, hh), jnp.float32),  # == Encoder.initHidden(B)
              jnp.zeros((2, B, hh), jnp.float32))

    out_r, (hn_r, cn_r) = encoder_forward_ref(params, input_ids, lengths, hidden)

    # f32 matmul-operand path: tight tolerance vs pure-JAX reference.
    out, (hn, cn) = encoder_forward(params, input_ids, lengths, hidden,
                                    compute_dtype=jnp.float32)
    out, hn, cn = jax.block_until_ready((out, hn, cn))
    assert out.shape == (B, T, hidden_size)
    assert hn.shape == (2, B, hh) and cn.shape == (2, B, hh)
    assert jnp.allclose(out, out_r, atol=1e-4, rtol=1e-4)
    assert jnp.allclose(hn, hn_r, atol=1e-4, rtol=1e-4)
    assert jnp.allclose(cn, cn_r, atol=1e-4, rtol=1e-4)

    # Default bf16 matmul-operand path (f32 accumulation + f32 state math):
    # looser tolerance for the bf16 operands / bf16 gx scratch.
    out_bf, (hn_bf, cn_bf) = encoder_forward(params, input_ids, lengths, hidden)
    out_bf = jax.block_until_ready(out_bf)
    assert out_bf.shape == (B, T, hidden_size)
    assert jnp.allclose(out_bf, out_r, atol=1e-1)
    assert jnp.allclose(hn_bf, hn_r, atol=1e-1)

    print("KERNEL_OK")
</pallas_src>

<mosaic_0001>
module attributes {stable_mosaic.version = 11 : i64} {
  func.func @_encoder_lstm_kernel(%arg0: i32, %arg1: memref<8x1xi32, #tpu.memory_space<vmem>>, %arg2: memref<8x8x128xf32, #tpu.memory_space<vmem>>, %arg3: memref<128x1024xf32, #tpu.memory_space<vmem>>, %arg4: memref<1x1024xf32, #tpu.memory_space<vmem>>, %arg5: memref<256x1024xf32, #tpu.memory_space<vmem>>, %arg6: memref<2x8x128xf32, #tpu.memory_space<vmem>>, %arg7: memref<2x8x128xf32, #tpu.memory_space<vmem>>, %arg8: memref<8x8x256xf32, #tpu.memory_space<vmem>>, %arg9: memref<2x8x128xf32, #tpu.memory_space<vmem>>, %arg10: memref<2x8x128xf32, #tpu.memory_space<vmem>>, %arg11: memref<8x8x1024xf32, #tpu.memory_space<vmem>>) attributes {dimension_semantics = [#tpu.dimension_semantics<parallel>], iteration_bounds = array<i64: 1>, scalar_prefetch = 0 : i64, scratch_operands = 1 : i64, tpu.core_type = #tpu.core_type<tc>, window_params = [{transform_indices = @transform_0, window_bounds = array<i64: 8, 1>}, {transform_indices = @transform_1, window_bounds = array<i64: 8, 8, 128>}, {pipeline_mode = #tpu.pipeline_mode<synchronous>, transform_indices = @transform_2, window_bounds = array<i64: 128, 1024>}, {pipeline_mode = #tpu.pipeline_mode<synchronous>, transform_indices = @transform_3, window_bounds = array<i64: 1, 1024>}, {pipeline_mode = #tpu.pipeline_mode<synchronous>, transform_indices = @transform_4, window_bounds = array<i64: 256, 1024>}, {transform_indices = @transform_5, window_bounds = array<i64: 2, 8, 128>}, {transform_indices = @transform_6, window_bounds = array<i64: 2, 8, 128>}, {transform_indices = @transform_7, window_bounds = array<i64: 8, 8, 256>}, {transform_indices = @transform_8, window_bounds = array<i64: 2, 8, 128>}, {transform_indices = @transform_9, window_bounds = array<i64: 2, 8, 128>}]} {
    %c0 = arith.constant 0 : index
    %c0_0 = arith.constant 0 : index
    %c0_1 = arith.constant 0 : index
    %0 = vector.load %arg2[%c0, %c0_0, %c0_1] : memref<8x8x128xf32, #tpu.memory_space<vmem>>, vector<8x8x128xf32>
    %1 = vector.shape_cast %0 : vector<8x8x128xf32> to vector<64x128xf32>
    %c0_2 = arith.constant 0 : index
    %c0_3 = arith.constant 0 : index
    %2 = vector.load %arg3[%c0_2, %c0_3] : memref<128x1024xf32, #tpu.memory_space<vmem>>, vector<128x1024xf32>
    %cst = arith.constant dense<0.000000e+00> : vector<64x1024xf32>
    %3 = tpu.matmul %1, %2, %cst {dimension_numbers = #tpu.dot_dimension_numbers<[1], [0], [0], [1], [0, 0, 1, 1], [], []>} : vector<64x128xf32>, vector<128x1024xf32>, vector<64x1024xf32> -> vector<64x1024xf32>
    %c0_4 = arith.constant 0 : index
    %c0_5 = arith.constant 0 : index
    %4 = vector.load %arg4[%c0_4, %c0_5] : memref<1x1024xf32, #tpu.memory_space<vmem>>, vector<1x1024xf32>
    %5 = vector.broadcast %4 : vector<1x1024xf32> to vector<64x1024xf32>
    %6 = arith.addf %3, %5 : vector<64x1024xf32>
    %7 = vector.shape_cast %6 : vector<64x1024xf32> to vector<8x8x1024xf32>
    %c0_6 = arith.constant 0 : index
    %c0_7 = arith.constant 0 : index
    %c0_8 = arith.constant 0 : index
    %8 = vector.load %arg11[%c0_6, %c0_7, %c0_8] : memref<8x8x1024xf32, #tpu.memory_space<vmem>>, vector<8x8x1024xf32>
    tpu.vector_store %arg11[%c0_6, %c0_7, %c0_8], %7 {strides = array<i32>} : memref<8x8x1024xf32, #tpu.memory_space<vmem>>, vector<8x8x1024xf32>,
    %c0_9 = arith.constant 0 : index
    %c0_10 = arith.constant 0 : index
    %9 = vector.load %arg5[%c0_9, %c0_10] : memref<256x1024xf32, #tpu.memory_space<vmem>>, vector<256x1024xf32>
    %c0_11 = arith.constant 0 : index
    %c0_12 = arith.constant 0 : index
    %10 = vector.load %arg1[%c0_11, %c0_12] : memref<8x1xi32, #tpu.memory_space<vmem>>, vector<8x1xi32>
    %c0_13 = arith.constant 0 : index
    %c0_14 = arith.constant 0 : index
    %c0_15 = arith.constant 0 : index
    %11 = vector.load %arg6[%c0_13, %c0_14, %c0_15] : memref<2x8x128xf32, #tpu.memory_space<vmem>>, vector<1x8x128xf32>
    %12 = vector.shape_cast %11 : vector<1x8x128xf32> to vector<8x128xf32>
    %c0_16 = arith.constant 0 : index
    %c0_17 = arith.constant 0 : index
    %c0_18 = arith.constant 0 : index
    %13 = vector.load %arg7[%c0_16, %c0_17, %c0_18] : memref<2x8x128xf32, #tpu.memory_space<vmem>>, vector<1x8x128xf32>
    %14 = vector.shape_cast %13 : vector<1x8x128xf32> to vector<8x128xf32>
    %c1 = arith.constant 1 : index
    %c0_19 = arith.constant 0 : index
    %c0_20 = arith.constant 0 : index
    %15 = vector.load %arg6[%c1, %c0_19, %c0_20] : memref<2x8x128xf32, #tpu.memory_space<vmem>>, vector<1x8x128xf32>
    %16 = vector.shape_cast %15 : vector<1x8x128xf32> to vector<8x128xf32>
    %c1_21 = arith.constant 1 : index
    %c0_22 = arith.constant 0 : index
    %c0_23 = arith.constant 0 : index
    %17 = vector.load %arg7[%c1_21, %c0_22, %c0_23] : memref<2x8x128xf32, #tpu.memory_space<vmem>>, vector<1x8x128xf32>
    %18 = vector.shape_cast %17 : vector<1x8x128xf32> to vector<8x128xf32>
    %c0_i32 = arith.constant 0 : i32
    %c8_i32 = arith.constant 8 : i32
    %19 = arith.addi %c0_i32, %c8_i32 : i32
    %c1_i32 = arith.constant 1 : i32
    %20:4 = scf.for %arg12 = %c0_i32 to %19 step %c1_i32 iter_args(%arg13 = %12, %arg14 = %14, %arg15 = %16, %arg16 = %18) -> (vector<8x128xf32>, vector<8x128xf32>, vector<8x128xf32>, vector<8x128xf32>)  : i32 {
      %c7_i32 = arith.constant 7 : i32
      %33 = arith.subi %c7_i32, %arg12 : i32
      %34 = vector.broadcast %arg12 : i32 to vector<8x1xi32>
      %35 = arith.cmpi sgt, %10, %34 : vector<8x1xi32>
      %36 = vector.broadcast %33 : i32 to vector<8x1xi32>
      %37 = arith.cmpi sgt, %10, %36 : vector<8x1xi32>
      %38 = tpu.concatenate %arg13, %arg15 in 1 : vector<8x128xf32>, vector<8x128xf32> -> vector<8x256xf32>
      %cst_37 = arith.constant dense<0.000000e+00> : vector<8x1024xf32>
      %39 = tpu.matmul %38, %9, %cst_37 {dimension_numbers = #tpu.dot_dimension_numbers<[1], [0], [0], [1], [0, 0, 1, 1], [], []>} : vector<8x256xf32>, vector<256x1024xf32>, vector<8x1024xf32> -> vector<8x1024xf32>
      %40 = arith.index_cast %arg12 : i32 to index
      %c0_38 = arith.constant 0 : index
      %c0_39 = arith.constant 0 : index
      %41 = vector.load %arg11[%40, %c0_38, %c0_39] : memref<8x8x1024xf32, #tpu.memory_space<vmem>>, vector<1x8x512xf32>
      %42 = vector.shape_cast %41 : vector<1x8x512xf32> to vector<8x512xf32>
      %43 = vector.extract_strided_slice %39 {offsets = [0, 0], sizes = [8, 512], strides = [1, 1]} : vector<8x1024xf32> to vector<8x512xf32>
      %44 = arith.addf %42, %43 : vector<8x512xf32>
      %45 = arith.index_cast %33 : i32 to index
      %c0_40 = arith.constant 0 : index
      %c512 = arith.constant 512 : index
      %46 = vector.load %arg11[%45, %c0_40, %c512] : memref<8x8x1024xf32, #tpu.memory_space<vmem>>, vector<1x8x512xf32>
      %47 = vector.shape_cast %46 : vector<1x8x512xf32> to vector<8x512xf32>
      %48 = vector.extract_strided_slice %39 {offsets = [0, 512], sizes = [8, 512], strides = [1, 1]} : vector<8x1024xf32> to vector<8x512xf32>
      %49 = arith.addf %47, %48 : vector<8x512xf32>
      %50 = vector.extract_strided_slice %44 {offsets = [0, 0], sizes = [8, 128], strides = [1, 1]} : vector<8x512xf32> to vector<8x128xf32>
      %cst_41 = arith.constant 5.000000e-01 : f32
      %51 = vector.broadcast %cst_41 : f32 to vector<8x128xf32>
      %52 = arith.mulf %51, %50 : vector<8x128xf32>
      %53 = math.tanh %52 : vector<8x128xf32>
      %cst_42 = arith.constant 5.000000e-01 : f32
      %54 = vector.broadcast %cst_42 : f32 to vector<8x128xf32>
      %55 = arith.mulf %54, %53 : vector<8x128xf32>
      %cst_43 = arith.constant 5.000000e-01 : f32
      %56 = vector.broadcast %cst_43 : f32 to vector<8x128xf32>
      %57 = arith.addf %55, %56 : vector<8x128xf32>
      %58 = vector.extract_strided_slice %44 {offsets = [0, 128], sizes = [8, 128], strides = [1, 1]} : vector<8x512xf32> to vector<8x128xf32>
      %cst_44 = arith.constant 5.000000e-01 : f32
      %59 = vector.broadcast %cst_44 : f32 to vector<8x128xf32>
      %60 = arith.mulf %59, %58 : vector<8x128xf32>
      %61 = math.tanh %60 : vector<8x128xf32>
      %cst_45 = arith.constant 5.000000e-01 : f32
      %62 = vector.broadcast %cst_45 : f32 to vector<8x128xf32>
      %63 = arith.mulf %62, %61 : vector<8x128xf32>
      %cst_46 = arith.constant 5.000000e-01 : f32
      %64 = vector.broadcast %cst_46 : f32 to vector<8x128xf32>
      %65 = arith.addf %63, %64 : vector<8x128xf32>
      %66 = vector.extract_strided_slice %44 {offsets = [0, 256], sizes = [8, 128], strides = [1, 1]} : vector<8x512xf32> to vector<8x128xf32>
      %67 = math.tanh %66 : vector<8x128xf32>
      %68 = vector.extract_strided_slice %44 {offsets = [0, 384], sizes = [8, 128], strides = [1, 1]} : vector<8x512xf32> to vector<8x128xf32>
      %cst_47 = arith.constant 5.000000e-01 : f32
      %69 = vector.broadcast %cst_47 : f32 to vector<8x128xf32>
      %70 = arith.mulf %69, %68 : vector<8x128xf32>
      %71 = math.tanh %70 : vector<8x128xf32>
      %cst_48 = arith.constant 5.000000e-01 : f32
      %72 = vector.broadcast %cst_48 : f32 to vector<8x128xf32>
      %73 = arith.mulf %72, %71 : vector<8x128xf32>
      %cst_49 = arith.constant 5.000000e-01 : f32
      %74 = vector.broadcast %cst_49 : f32 to vector<8x128xf32>
      %75 = arith.addf %73, %74 : vector<8x128xf32>
      %76 = arith.mulf %65, %arg14 : vector<8x128xf32>
      %77 = arith.mulf %57, %67 : vector<8x128xf32>
      %78 = arith.addf %76, %77 : vector<8x128xf32>
      %79 = math.tanh %78 : vector<8x128xf32>
      %80 = arith.mulf %75, %79 : vector<8x128xf32>
      %81 = vector.extract_strided_slice %49 {offsets = [0, 0], sizes = [8, 128], strides = [1, 1]} : vector<8x512xf32> to vector<8x128xf32>
      %cst_50 = arith.constant 5.000000e-01 : f32
      %82 = vector.broadcast %cst_50 : f32 to vector<8x128xf32>
      %83 = arith.mulf %82, %81 : vector<8x128xf32>
      %84 = math.tanh %83 : vector<8x128xf32>
      %cst_51 = arith.constant 5.000000e-01 : f32
      %85 = vector.broadcast %cst_51 : f32 to vector<8x128xf32>
      %86 = arith.mulf %85, %84 : vector<8x128xf32>
      %cst_52 = arith.constant 5.000000e-01 : f32
      %87 = vector.broadcast %cst_52 : f32 to vector<8x128xf32>
      %88 = arith.addf %86, %87 : vector<8x128xf32>
      %89 = vector.extract_strided_slice %49 {offsets = [0, 128], sizes = [8, 128], strides = [1, 1]} : vector<8x512xf32> to vector<8x128xf32>
      %cst_53 = arith.constant 5.000000e-01 : f32
      %90 = vector.broadcast %cst_53 : f32 to vector<8x128xf32>
      %91 = arith.mulf %90, %89 : vector<8x128xf32>
      %92 = math.tanh %91 : vector<8x128xf32>
      %cst_54 = arith.constant 5.000000e-01 : f32
      %93 = vector.broadcast %cst_54 : f32 to vector<8x128xf32>
      %94 = arith.mulf %93, %92 : vector<8x128xf32>
      %cst_55 = arith.constant 5.000000e-01 : f32
      %95 = vector.broadcast %cst_55 : f32 to vector<8x128xf32>
      %96 = arith.addf %94, %95 : vector<8x128xf32>
      %97 = vector.extract_strided_slice %49 {offsets = [0, 256], sizes = [8, 128], strides = [1, 1]} : vector<8x512xf32> to vector<8x128xf32>
      %98 = math.tanh %97 : vector<8x128xf32>
      %99 = vector.extract_strided_slice %49 {offsets = [0, 384], sizes = [8, 128], strides = [1, 1]} : vector<8x512xf32> to vector<8x128xf32>
      %cst_56 = arith.constant 5.000000e-01 : f32
      %100 = vector.broadcast %cst_56 : f32 to vector<8x128xf32>
      %101 = arith.mulf %100, %99 : vector<8x128xf32>
      %102 = math.tanh %101 : vector<8x128xf32>
      %cst_57 = arith.constant 5.000000e-01 : f32
      %103 = vector.broadcast %cst_57 : f32 to vector<8x128xf32>
      %104 = arith.mulf %103, %102 : vector<8x128xf32>
      %cst_58 = arith.constant 5.000000e-01 : f32
      %105 = vector.broadcast %cst_58 : f32 to vector<8x128xf32>
      %106 = arith.addf %104, %105 : vector<8x128xf32>
      %107 = arith.mulf %96, %arg16 : vector<8x128xf32>
      %108 = arith.mulf %88, %98 : vector<8x128xf32>
      %109 = arith.addf %107, %108 : vector<8x128xf32>
      %110 = math.tanh %109 : vector<8x128xf32>
      %111 = arith.mulf %106, %110 : vector<8x128xf32>
      %cst_59 = arith.constant 0.000000e+00 : f32
      %112 = vector.shape_cast %35 : vector<8x1xi1> to vector<8x1xi1>
      %113 = vector.broadcast %112 : vector<8x1xi1> to vector<8x128xi1>
      %114 = vector.broadcast %cst_59 : f32 to vector<8x128xf32>
      %115 = arith.select %113, %80, %114 : vector<8x128xi1>, vector<8x128xf32>
      %116 = arith.index_cast %arg12 : i32 to index
      %c0_60 = arith.constant 0 : index
      %c0_61 = arith.constant 0 : index
      %117 = vector.load %arg8[%116, %c0_60, %c0_61] : memref<8x8x256xf32, #tpu.memory_space<vmem>>, vector<1x8x128xf32>
      %118 = vector.shape_cast %117 : vector<1x8x128xf32> to vector<8x128xf32>
      %119 = vector.shape_cast %115 : vector<8x128xf32> to vector<1x8x128xf32>
      tpu.vector_store %arg8[%116, %c0_60, %c0_61], %119 {strides = array<i32>} : memref<8x8x256xf32, #tpu.memory_space<vmem>>, vector<1x8x128xf32>,
      %cst_62 = arith.constant 0.000000e+00 : f32
      %120 = vector.shape_cast %37 : vector<8x1xi1> to vector<8x1xi1>
      %121 = vector.broadcast %120 : vector<8x1xi1> to vector<8x128xi1>
      %122 = vector.broadcast %cst_62 : f32 to vector<8x128xf32>
      %123 = arith.select %121, %111, %122 : vector<8x128xi1>, vector<8x128xf32>
      %124 = arith.index_cast %33 : i32 to index
      %c0_63 = arith.constant 0 : index
      %c128 = arith.constant 128 : index
      %125 = vector.load %arg8[%124, %c0_63, %c128] : memref<8x8x256xf32, #tpu.memory_space<vmem>>, vector<1x8x128xf32>
      %126 = vector.shape_cast %125 : vector<1x8x128xf32> to vector<8x128xf32>
      %127 = vector.shape_cast %123 : vector<8x128xf32> to vector<1x8x128xf32>
      tpu.vector_store %arg8[%124, %c0_63, %c128], %127 {strides = array<i32>} : memref<8x8x256xf32, #tpu.memory_space<vmem>>, vector<1x8x128xf32>,
      %128 = vector.shape_cast %35 : vector<8x1xi1> to vector<8x1xi1>
      %129 = vector.broadcast %128 : vector<8x1xi1> to vector<8x128xi1>
      %130 = arith.select %129, %80, %arg13 : vector<8x128xi1>, vector<8x128xf32>
      %131 = vector.shape_cast %35 : vector<8x1xi1> to vector<8x1xi1>
      %132 = vector.broadcast %131 : vector<8x1xi1> to vector<8x128xi1>
      %133 = arith.select %132, %78, %arg14 : vector<8x128xi1>, vector<8x128xf32>
      %134 = vector.shape_cast %37 : vector<8x1xi1> to vector<8x1xi1>
      %135 = vector.broadcast %134 : vector<8x1xi1> to vector<8x128xi1>
      %136 = arith.select %135, %111, %arg15 : vector<8x128xi1>, vector<8x128xf32>
      %137 = vector.shape_cast %37 : vector<8x1xi1> to vector<8x1xi1>
      %138 = vector.broadcast %137 : vector<8x1xi1> to vector<8x128xi1>
      %139 = arith.select %138, %109, %arg16 : vector<8x128xi1>, vector<8x128xf32>
      scf.yield %130, %133, %136, %139 : vector<8x128xf32>, vector<8x128xf32>, vector<8x128xf32>, vector<8x128xf32>
    }
    %c8_i32_24 = arith.constant 8 : i32
    %c0_25 = arith.constant 0 : index
    %c0_26 = arith.constant 0 : index
    %c0_27 = arith.constant 0 : index
    %21 = vector.load %arg9[%c0_25, %c0_26, %c0_27] : memref<2x8x128xf32, #tpu.memory_space<vmem>>, vector<1x8x128xf32>
    %22 = vector.shape_cast %21 : vector<1x8x128xf32> to vector<8x128xf32>
    %23 = vector.shape_cast %20#0 : vector<8x128xf32> to vector<1x8x128xf32>
    tpu.vector_store %arg9[%c0_25, %c0_26, %c0_27], %23 {strides = array<i32>} : memref<2x8x128xf32, #tpu.memory_space<vmem>>, vector<1x8x128xf32>,
    %c0_28 = arith.constant 0 : index
    %c0_29 = arith.constant 0 : index
    %c0_30 = arith.constant 0 : index
    %24 = vector.load %arg10[%c0_28, %c0_29, %c0_30] : memref<2x8x128xf32, #tpu.memory_space<vmem>>, vector<1x8x128xf32>
    %25 = vector.shape_cast %24 : vector<1x8x128xf32> to vector<8x128xf32>
    %26 = vector.shape_cast %20#1 : vector<8x128xf32> to vector<1x8x128xf32>
    tpu.vector_store %arg10[%c0_28, %c0_29, %c0_30], %26 {strides = array<i32>} : memref<2x8x128xf32, #tpu.memory_space<vmem>>, vector<1x8x128xf32>,
    %c1_31 = arith.constant 1 : index
    %c0_32 = arith.constant 0 : index
    %c0_33 = arith.constant 0 : index
    %27 = vector.load %arg9[%c1_31, %c0_32, %c0_33] : memref<2x8x128xf32, #tpu.memory_space<vmem>>, vector<1x8x128xf32>
    %28 = vector.shape_cast %27 : vector<1x8x128xf32> to vector<8x128xf32>
    %29 = vector.shape_cast %20#2 : vector<8x128xf32> to vector<1x8x128xf32>
    tpu.vector_store %arg9[%c1_31, %c0_32, %c0_33], %29 {strides = array<i32>} : memref<2x8x128xf32, #tpu.memory_space<vmem>>, vector<1x8x128xf32>,
    %c1_34 = arith.constant 1 : index
    %c0_35 = arith.constant 0 : index
    %c0_36 = arith.constant 0 : index
    %30 = vector.load %arg10[%c1_34, %c0_35, %c0_36] : memref<2x8x128xf32, #tpu.memory_space<vmem>>, vector<1x8x128xf32>
    %31 = vector.shape_cast %30 : vector<1x8x128xf32> to vector<8x128xf32>
    %32 = vector.shape_cast %20#3 : vector<8x128xf32> to vector<1x8x128xf32>
    tpu.vector_store %arg10[%c1_34, %c0_35, %c0_36], %32 {strides = array<i32>} : memref<2x8x128xf32, #tpu.memory_space<vmem>>, vector<1x8x128xf32>,
    return
  }
  func.func @transform_0(%arg0: i32) -> (i32, i32) {
    %c0_i32 = arith.constant 0 : i32
    %c0_i32_0 = arith.constant 0 : i32
    return %arg0, %c0_i32 : i32, i32
  }
  func.func @transform_1(%arg0: i32) -> (i32, i32, i32) {
    %c0_i32 = arith.constant 0 : i32
    %c0_i32_0 = arith.constant 0 : i32
    %c0_i32_1 = arith.constant 0 : i32
    return %c0_i32, %arg0, %c0_i32_0 : i32, i32, i32
  }
  func.func @transform_2(%arg0: i32) -> (i32, i32) {
    %c0_i32 = arith.constant 0 : i32
    %c0_i32_0 = arith.constant 0 : i32
    %c0_i32_1 = arith.constant 0 : i32
    return %c0_i32, %c0_i32_0 : i32, i32
  }
  func.func @transform_3(%arg0: i32) -> (i32, i32) {
    %c0_i32 = arith.constant 0 : i32
    %c0_i32_0 = arith.constant 0 : i32
    %c0_i32_1 = arith.constant 0 : i32
    return %c0_i32, %c0_i32_0 : i32, i32
  }
  func.func @transform_4(%arg0: i32) -> (i32, i32) {
    %c0_i32 = arith.constant 0 : i32
    %c0_i32_0 = arith.constant 0 : i32
    %c0_i32_1 = arith.constant 0 : i32
    return %c0_i32, %c0_i32_0 : i32, i32
  }
  func.func @transform_5(%arg0: i32) -> (i32, i32, i32) {
    %c0_i32 = arith.constant 0 : i32
    %c0_i32_0 = arith.constant 0 : i32
    %c0_i32_1 = arith.constant 0 : i32
    return %c0_i32, %arg0, %c0_i32_0 : i32, i32, i32
  }
  func.func @transform_6(%arg0: i32) -> (i32, i32, i32) {
    %c0_i32 = arith.constant 0 : i32
    %c0_i32_0 = arith.constant 0 : i32
    %c0_i32_1 = arith.constant 0 : i32
    return %c0_i32, %arg0, %c0_i32_0 : i32, i32, i32
  }
  func.func @transform_7(%arg0: i32) -> (i32, i32, i32) {
    %c0_i32 = arith.constant 0 : i32
    %c0_i32_0 = arith.constant 0 : i32
    %c0_i32_1 = arith.constant 0 : i32
    return %c0_i32, %arg0, %c0_i32_0 : i32, i32, i32
  }
  func.func @transform_8(%arg0: i32) -> (i32, i32, i32) {
    %c0_i32 = arith.constant 0 : i32
    %c0_i32_0 = arith.constant 0 : i32
    %c0_i32_1 = arith.constant 0 : i32
    return %c0_i32, %arg0, %c0_i32_0 : i32, i32, i32
  }
  func.func @transform_9(%arg0: i32) -> (i32, i32, i32) {
    %c0_i32 = arith.constant 0 : i32
    %c0_i32_0 = arith.constant 0 : i32
    %c0_i32_1 = arith.constant 0 : i32
    return %c0_i32, %arg0, %c0_i32_0 : i32, i32, i32
  }
}

</mosaic_0001>

<bundles_post_ra>
// kernel: encoder_forward.1
= control target key start
LH: loop header
LB: loop body
LE: loop exit
PB: predicated region body
PF: predicated region fallthrough
CT: control target
= control target key end

     0   :  { %v1913_v3 = vmov 0.0   ;;  %s4192_s2 = inlined_call_operand.vmem [shape: f32[128,1024], index: 2, kind: input, shape index: {}]   ;;  %s4193_s7 = inlined_call_operand.vmem [shape: f32[8,8,256], index: 7, kind: output, shape index: {0}]   ;;  %s4194_s8 = inlined_call_operand.vmem [shape: f32[2,8,128], index: 8, kind: output, shape index: {1}]   ;;  %s4195_s9 = inlined_call_operand.vmem [shape: f32[2,8,128], index: 9, kind: output, shape index: {2}]   ;;  %s4196_s1 = inlined_call_operand.vmem [shape: f32[8,8,128], index: 1, kind: input, shape index: {}]   ;;  %s4197_s4 = inlined_call_operand.vmem [shape: f32[256,1024], index: 4, kind: input, shape index: {}]   ;;  %s4198_s3 = inlined_call_operand.vmem [shape: f32[1,1024], index: 3, kind: input, shape index: {}]   ;;  %s4199_s0 = inlined_call_operand.vmem [shape: s32[8,1], index: 0, kind: input, shape index: {}]   ;;  %s4200_s5 = inlined_call_operand.vmem [shape: f32[2,8,128], index: 5, kind: input, shape index: {}]   ;;  %s4201_s6 = inlined_call_operand.vmem [shape: f32[2,8,128], index: 6, kind: input, shape index: {}]  }
   0x1   :  { %v38_v0 = vld [vmem:[%s4192_s2 + $0x8] sm:$0xff]  ;;  %v40_v2 = vld [vmem:[%s4192_s2 + $0x18] sm:$0xff]  ;;  %271 = vmatprep.mubr.f32.mxu0 %v1913_v3  ;;  %384 = vmatprep.mubr.f32.mxu1 %v1913_v3  ;;  %v37_v6 = vld [vmem:[%s4192_s2] sm:$0xff] }
   0x2   :  { %v46_v1 = vld [vmem:[%s4192_s2 + $0x48] sm:$0xff]  ;;  %v48_v5 = vld [vmem:[%s4192_s2 + $0x58] sm:$0xff]  ;;  %v45_v7 = vld [vmem:[%s4192_s2 + $0x40] sm:$0xff] }
   0x3   :  { %v1426_v4 = vpack.c.bf16 %v46_v1, %v38_v0  ;;  %v1458_v8 = vpack.c.bf16 %v48_v5, %v40_v2  ;;  %v1428_v9 = vpack.c.bf16 %v45_v7, %v37_v6  ;;  %v39_v10 = vld [vmem:[%s4192_s2 + $0x10] sm:$0xff]  ;;  %v54_v12 = vld [vmem:[%s4192_s2 + $0x88] sm:$0xff]  ;;  %v56_v15 = vld [vmem:[%s4192_s2 + $0x98] sm:$0xff] }
   0x4   :  { %v47_v11 = vld [vmem:[%s4192_s2 + $0x50] sm:$0xff]  ;;  %v62_v14 = vld [vmem:[%s4192_s2 + $0xc8] sm:$0xff]  ;;  %v64_v16 = vld [vmem:[%s4192_s2 + $0xd8] sm:$0xff] }
   0x5   :  { %1427 = vmatprep.subr.bf16.mxu0 %v1426_v4  ;;  %v1460_v13 = vpack.c.bf16 %v47_v11, %v39_v10  ;;  %1459 = vmatprep.subr.bf16.mxu1 %v1458_v8  ;;  %v1430_v17 = vpack.c.bf16 %v62_v14, %v54_v12  ;;  %v1462_v18 = vpack.c.bf16 %v64_v16, %v56_v15  ;;  %v53_v19 = vld [vmem:[%s4192_s2 + $0x80] sm:$0xff]  ;;  %v55_v21 = vld [vmem:[%s4192_s2 + $0x90] sm:$0xff]  ;;  %v70_v24 = vld [vmem:[%s4192_s2 + $0x108] sm:$0xff] }
   0x6   :  { %1429 = vmatpush1.bf16.msra.mxu0 %v1428_v9  ;;  %v61_v20 = vld [vmem:[%s4192_s2 + $0xc0] sm:$0xff]  ;;  %v63_v23 = vld [vmem:[%s4192_s2 + $0xd0] sm:$0xff]  ;;  %v78_v25 = vld [vmem:[%s4192_s2 + $0x148] sm:$0xff] }
   0x7   :  { %1461 = vmatpush1.bf16.msra.mxu1 %v1460_v13  ;;  %v1432_v22 = vpack.c.bf16 %v61_v20, %v53_v19  ;;  %1431 = vmatprep.subr.bf16.mxu0 %v1430_v17  ;;  %v1464_v26 = vpack.c.bf16 %v63_v23, %v55_v21  ;;  %v1434_v27 = vpack.c.bf16 %v78_v25, %v70_v24  ;;  %v72_v28 = vld [vmem:[%s4192_s2 + $0x118] sm:$0xff]  ;;  %v69_v30 = vld [vmem:[%s4192_s2 + $0x100] sm:$0xff]  ;;  %v71_v33 = vld [vmem:[%s4192_s2 + $0x110] sm:$0xff] }
   0x8   :  { %1463 = vmatprep.subr.bf16.mxu1 %v1462_v18  ;;  %v80_v29 = vld [vmem:[%s4192_s2 + $0x158] sm:$0xff]  ;;  %v77_v32 = vld [vmem:[%s4192_s2 + $0x140] sm:$0xff]  ;;  %v79_v34 = vld [vmem:[%s4192_s2 + $0x150] sm:$0xff] }
   0x9   :  { %v1466_v31 = vpack.c.bf16 %v80_v29, %v72_v28  ;;  %v1436_v35 = vpack.c.bf16 %v77_v32, %v69_v30  ;;  %v86_v36 = vld [vmem:[%s4192_s2 + $0x188] sm:$0xff]  ;;  %v88_v38 = vld [vmem:[%s4192_s2 + $0x198] sm:$0xff]  ;;  %v1468_v39 = vpack.c.bf16 %v79_v34, %v71_v33  ;;  %v85_v42 = vld [vmem:[%s4192_s2 + $0x180] sm:$0xff] }
   0xa   :  { %1433 = vmatpush1.bf16.msra.mxu0 %v1432_v22  ;;  %v94_v37 = vld [vmem:[%s4192_s2 + $0x1c8] sm:$0xff]  ;;  %v96_v41 = vld [vmem:[%s4192_s2 + $0x1d8] sm:$0xff]  ;;  %v93_v43 = vld [vmem:[%s4192_s2 + $0x1c0] sm:$0xff] }
   0xb   :  { %1465 = vmatpush1.bf16.msra.mxu1 %v1464_v26  ;;  %1435 = vmatprep.subr.bf16.mxu0 %v1434_v27  ;;  %v1438_v40 = vpack.c.bf16 %v94_v37, %v86_v36  ;;  %v1470_v44 = vpack.c.bf16 %v96_v41, %v88_v38  ;;  %v87_v45 = vld [vmem:[%s4192_s2 + $0x190] sm:$0xff]  ;;  %v102_v47 = vld [vmem:[%s4192_s2 + $0x208] sm:$0xff]  ;;  %v104_v49 = vld [vmem:[%s4192_s2 + $0x218] sm:$0xff]  ;;  %v1440_v51 = vpack.c.bf16 %v93_v43, %v85_v42 }
   0xc   :  { %1467 = vmatprep.subr.bf16.mxu1 %v1466_v31  ;;  %v95_v46 = vld [vmem:[%s4192_s2 + $0x1d0] sm:$0xff]  ;;  %v110_v48 = vld [vmem:[%s4192_s2 + $0x248] sm:$0xff]  ;;  %v112_v50 = vld [vmem:[%s4192_s2 + $0x258] sm:$0xff] }
   0xd   :  { %v1472_v52 = vpack.c.bf16 %v95_v46, %v87_v45  ;;  %v1442_v53 = vpack.c.bf16 %v110_v48, %v102_v47  ;;  %v101_v54 = vld [vmem:[%s4192_s2 + $0x200] sm:$0xff]  ;;  %v103_v56 = vld [vmem:[%s4192_s2 + $0x210] sm:$0xff]  ;;  %v1474_v57 = vpack.c.bf16 %v112_v50, %v104_v49  ;;  %v118_v59 = vld [vmem:[%s4192_s2 + $0x288] sm:$0xff] }
   0xe   :  { %1437 = vmatpush1.bf16.msra.mxu0 %v1436_v35  ;;  %v109_v55 = vld [vmem:[%s4192_s2 + $0x240] sm:$0xff]  ;;  %v111_v58 = vld [vmem:[%s4192_s2 + $0x250] sm:$0xff]  ;;  %v126_v60 = vld [vmem:[%s4192_s2 + $0x2c8] sm:$0xff] }
   0xf   :  { %1469 = vmatpush1.bf16.msra.mxu1 %v1468_v39  ;;  %1439 = vmatprep.subr.bf16.mxu0 %v1438_v40  ;;  %v120_v61 = vld [vmem:[%s4192_s2 + $0x298] sm:$0xff]  ;;  %v1444_v63 = vpack.c.bf16 %v109_v55, %v101_v54  ;;  %v1476_v0 = vpack.c.bf16 %v111_v58, %v103_v56  ;;  %v1446_v1 = vpack.c.bf16 %v126_v60, %v118_v59  ;;  %v117_v2 = vld [vmem:[%s4192_s2 + $0x280] sm:$0xff]  ;;  %v119_v5 = vld [vmem:[%s4192_s2 + $0x290] sm:$0xff] }
  0x10   :  { %1471 = vmatprep.subr.bf16.mxu1 %v1470_v44  ;;  %v128_v62 = vld [vmem:[%s4192_s2 + $0x2d8] sm:$0xff]  ;;  %v125_v4 = vld [vmem:[%s4192_s2 + $0x2c0] sm:$0xff]  ;;  %v127_v7 = vld [vmem:[%s4192_s2 + $0x2d0] sm:$0xff] }
  0x11   :  { %v1478_v6 = vpack.c.bf16 %v128_v62, %v120_v61  ;;  %v134_v8 = vld [vmem:[%s4192_s2 + $0x308] sm:$0xff]  ;;  %v136_v10 = vld [vmem:[%s4192_s2 + $0x318] sm:$0xff]  ;;  %v1448_v12 = vpack.c.bf16 %v125_v4, %v117_v2  ;;  %v1480_v13 = vpack.c.bf16 %v127_v7, %v119_v5  ;;  %v133_v15 = vld [vmem:[%s4192_s2 + $0x300] sm:$0xff] }
  0x12   :  { %1441 = vmatpush1.bf16.msra.mxu0 %v1440_v51  ;;  %v142_v9 = vld [vmem:[%s4192_s2 + $0x348] sm:$0xff]  ;;  %v144_v11 = vld [vmem:[%s4192_s2 + $0x358] sm:$0xff]  ;;  %v141_v16 = vld [vmem:[%s4192_s2 + $0x340] sm:$0xff] }
  0x13   :  { %1473 = vmatpush1.bf16.msra.mxu1 %v1472_v52  ;;  %1443 = vmatprep.subr.bf16.mxu0 %v1442_v53  ;;  %v1450_v14 = vpack.c.bf16 %v142_v9, %v134_v8  ;;  %v135_v17 = vld [vmem:[%s4192_s2 + $0x310] sm:$0xff]  ;;  %v1482_v18 = vpack.c.bf16 %v144_v11, %v136_v10  ;;  %v150_v20 = vld [vmem:[%s4192_s2 + $0x388] sm:$0xff]  ;;  %v152_v22 = vld [vmem:[%s4192_s2 + $0x398] sm:$0xff]  ;;  %v1452_v24 = vpack.c.bf16 %v141_v16, %v133_v15 }
  0x14   :  { %1475 = vmatprep.subr.bf16.mxu1 %v1474_v57  ;;  %v143_v19 = vld [vmem:[%s4192_s2 + $0x350] sm:$0xff]  ;;  %v158_v21 = vld [vmem:[%s4192_s2 + $0x3c8] sm:$0xff]  ;;  %v160_v23 = vld [vmem:[%s4192_s2 + $0x3d8] sm:$0xff] }
  0x15   :  { %v1484_v25 = vpack.c.bf16 %v143_v19, %v135_v17  ;;  %v1454_v26 = vpack.c.bf16 %v158_v21, %v150_v20  ;;  %v149_v27 = vld [vmem:[%s4192_s2 + $0x380] sm:$0xff]  ;;  %v151_v29 = vld [vmem:[%s4192_s2 + $0x390] sm:$0xff]  ;;  %v1486_v30 = vpack.c.bf16 %v160_v23, %v152_v22  ;;  %v42_v32 = vld [vmem:[%s4192_s2 + $0x28] sm:$0xff] }
  0x16   :  { %1445 = vmatpush1.bf16.msra.mxu0 %v1444_v63  ;;  %v157_v28 = vld [vmem:[%s4192_s2 + $0x3c0] sm:$0xff]  ;;  %v159_v31 = vld [vmem:[%s4192_s2 + $0x3d0] sm:$0xff]  ;;  %v50_v33 = vld [vmem:[%s4192_s2 + $0x68] sm:$0xff] }
  0x17   :  { %1477 = vmatpush1.bf16.msra.mxu1 %v1476_v0  ;;  %1447 = vmatprep.subr.bf16.mxu0 %v1446_v1  ;;  %v44_v34 = vld [vmem:[%s4192_s2 + $0x38] sm:$0xff]  ;;  %v1456_v36 = vpack.c.bf16 %v157_v28, %v149_v27  ;;  %v1488_v37 = vpack.c.bf16 %v159_v31, %v151_v29  ;;  %v1490_v38 = vpack.c.bf16 %v50_v33, %v42_v32  ;;  %v41_v39 = vld [vmem:[%s4192_s2 + $0x20] sm:$0xff]  ;;  %v43_v42 = vld [vmem:[%s4192_s2 + $0x30] sm:$0xff] }
  0x18   :  { %1479 = vmatprep.subr.bf16.mxu1 %v1478_v6  ;;  %v52_v35 = vld [vmem:[%s4192_s2 + $0x78] sm:$0xff]  ;;  %v49_v40 = vld [vmem:[%s4192_s2 + $0x60] sm:$0xff]  ;;  %v51_v43 = vld [vmem:[%s4192_s2 + $0x70] sm:$0xff] }
  0x19   :  { %v1522_v41 = vpack.c.bf16 %v52_v35, %v44_v34  ;;  %v58_v44 = vld [vmem:[%s4192_s2 + $0xa8] sm:$0xff]  ;;  %v2192_v46 = vld [vmem:[%s4196_s1] sm:$0xff]  ;;  %v1492_v47 = vpack.c.bf16 %v49_v40, %v41_v39  ;;  %v60_v48 = vld [vmem:[%s4192_s2 + $0xb8] sm:$0xff]  ;;  %v1524_v50 = vpack.c.bf16 %v51_v43, %v43_v42 }
  0x1a   :  { %1449 = vmatpush1.bf16.msra.mxu0 %v1448_v12  ;;  %v66_v45 = vld [vmem:[%s4192_s2 + $0xe8] sm:$0xff]  ;;  %v68_v49 = vld [vmem:[%s4192_s2 + $0xf8] sm:$0xff]  ;;  %v57_v51 = vld [vmem:[%s4192_s2 + $0xa0] sm:$0xff] }
  0x1b   :  { %1481 = vmatpush1.bf16.msra.mxu1 %v1480_v13  ;;  %1451 = vmatprep.subr.bf16.mxu0 %v1450_v14  ;;  %v65_v52 = vld [vmem:[%s4192_s2 + $0xe0] sm:$0xff]  ;;  %v1494_v53 = vpack.c.bf16 %v66_v45, %v58_v44  ;;  %v59_v54 = vld [vmem:[%s4192_s2 + $0xb0] sm:$0xff]  ;;  %v1526_v56 = vpack.c.bf16 %v68_v49, %v60_v48  ;;  %v74_v57 = vld [vmem:[%s4192_s2 + $0x128] sm:$0xff] }
  0x1c   :  { %1483 = vmatprep.subr.bf16.mxu1 %v1482_v18  ;;  %v67_v55 = vld [vmem:[%s4192_s2 + $0xf0] sm:$0xff]  ;;  %v82_v58 = vld [vmem:[%s4192_s2 + $0x168] sm:$0xff]  ;;  %v1496_v60 = vpack.c.bf16 %v65_v52, %v57_v51  ;;  %v76_v61 = vld [vmem:[%s4192_s2 + $0x138] sm:$0xff] }
  0x1d   :  { %v2223_v59 = vld [vmem:[%s4196_s1 + $0x8] sm:$0xff]  ;;  %v84_v62 = vld [vmem:[%s4192_s2 + $0x178] sm:$0xff]  ;;  %v1528_v63 = vpack.c.bf16 %v67_v55, %v59_v54  ;;  %v73_v0 = vld [vmem:[%s4192_s2 + $0x120] sm:$0xff]  ;;  %v1498_v2 = vpack.c.bf16 %v82_v58, %v74_v57 }
  0x1e   :  { %1453 = vmatpush1.bf16.msra.mxu0 %v1452_v24  ;;  %v81_v1 = vld [vmem:[%s4192_s2 + $0x160] sm:$0xff]  ;;  %v75_v4 = vld [vmem:[%s4192_s2 + $0x130] sm:$0xff]  ;;  %v1530_v6 = vpack.c.bf16 %v84_v62, %v76_v61  ;;  %v90_v7 = vld [vmem:[%s4192_s2 + $0x1a8] sm:$0xff] }
  0x1f   :  { %1485 = vmatpush1.bf16.msra.mxu1 %v1484_v25  ;;  %1455 = vmatprep.subr.bf16.mxu0 %v1454_v26  ;;  %v83_v5 = vld [vmem:[%s4192_s2 + $0x170] sm:$0xff]  ;;  %v98_v8 = vld [vmem:[%s4192_s2 + $0x1e8] sm:$0xff]  ;;  %v1500_v10 = vpack.c.bf16 %v81_v1, %v73_v0  ;;  %v92_v11 = vld [vmem:[%s4192_s2 + $0x1b8] sm:$0xff] }
  0x20   :  { %1487 = vmatprep.subr.bf16.mxu1 %v1486_v30  ;;  %v2256_v9 = vld [vmem:[%s4196_s1 + $0x10] sm:$0xff]  ;;  %v100_v12 = vld [vmem:[%s4192_s2 + $0x1f8] sm:$0xff]  ;;  %v1532_v13 = vpack.c.bf16 %v83_v5, %v75_v4  ;;  %v89_v14 = vld [vmem:[%s4192_s2 + $0x1a0] sm:$0xff]  ;;  %v1502_v16 = vpack.c.bf16 %v98_v8, %v90_v7 }
  0x21   :  { %v97_v15 = vld [vmem:[%s4192_s2 + $0x1e0] sm:$0xff]  ;;  %v91_v17 = vld [vmem:[%s4192_s2 + $0x1b0] sm:$0xff]  ;;  %v1534_v19 = vpack.c.bf16 %v100_v12, %v92_v11  ;;  %v106_v20 = vld [vmem:[%s4192_s2 + $0x228] sm:$0xff] }
  0x22   :  { %1457 = vmatpush1.bf16.msra.mxu0 %v1456_v36  ;;  %v99_v18 = vld [vmem:[%s4192_s2 + $0x1f0] sm:$0xff]  ;;  %v114_v21 = vld [vmem:[%s4192_s2 + $0x268] sm:$0xff]  ;;  %v2289_v22 = vld [vmem:[%s4196_s1 + $0x18] sm:$0xff]  ;;  %v1504_v23 = vpack.c.bf16 %v97_v15, %v89_v14 }
  0x23   :  { %1489 = vmatpush1.bf16.msra.mxu1 %v1488_v37  ;;  %1491 = vmatprep.subr.bf16.mxu0 %v1490_v38  ;;  %v108_v24 = vld [vmem:[%s4192_s2 + $0x238] sm:$0xff]  ;;  %v1536_v26 = vpack.c.bf16 %v99_v18, %v91_v17  ;;  %v105_v27 = vld [vmem:[%s4192_s2 + $0x220] sm:$0xff]  ;;  %v1506_v29 = vpack.c.bf16 %v114_v21, %v106_v20  ;;  %v107_v30 = vld [vmem:[%s4192_s2 + $0x230] sm:$0xff] }
  0x24   :  { %1523 = vmatprep.subr.bf16.mxu1 %v1522_v41  ;;  %v116_v25 = vld [vmem:[%s4192_s2 + $0x278] sm:$0xff]  ;;  %v113_v28 = vld [vmem:[%s4192_s2 + $0x260] sm:$0xff]  ;;  %v115_v31 = vld [vmem:[%s4192_s2 + $0x270] sm:$0xff] }
  0x25   :  { %272 = vmatmul.mubr.f32.vlgmr.msra.gmra.mrb[0].mxu0 %v2192_v46  ;;  %v1538_v32 = vpack.c.bf16 %v116_v25, %v108_v24  ;;  %v122_v33 = vld [vmem:[%s4192_s2 + $0x2a8] sm:$0xff]  ;;  %v2322_v35 = vld [vmem:[%s4196_s1 + $0x20] sm:$0xff]  ;;  %v1508_v36 = vpack.c.bf16 %v113_v28, %v105_v27  ;;  %v124_v37 = vld [vmem:[%s4192_s2 + $0x2b8] sm:$0xff]  ;;  %v1540_v39 = vpack.c.bf16 %v115_v31, %v107_v30 }
  0x26   :  { %385 = vmatmul.mubr.f32.vlgmr.msra.gmra.mrb[0].mxu1 %v2192_v46  ;;  %1493 = vmatpush1.bf16.msra.mxu0 %v1492_v47  ;;  %v130_v34 = vld [vmem:[%s4192_s2 + $0x2e8] sm:$0xff]  ;;  %v132_v38 = vld [vmem:[%s4192_s2 + $0x2f8] sm:$0xff]  ;;  %v121_v40 = vld [vmem:[%s4192_s2 + $0x2a0] sm:$0xff] }
  0x27   :  { %1525 = vmatpush1.bf16.msra.mxu1 %v1524_v50  ;;  %277 = vmatprep.mubr.f32.mxu0 %v1913_v3  ;;  %v129_v41 = vld [vmem:[%s4192_s2 + $0x2e0] sm:$0xff]  ;;  %v1510_v42 = vpack.c.bf16 %v130_v34, %v122_v33  ;;  %v123_v43 = vld [vmem:[%s4192_s2 + $0x2b0] sm:$0xff]  ;;  %v1542_v45 = vpack.c.bf16 %v132_v38, %v124_v37  ;;  %v138_v47 = vld [vmem:[%s4192_s2 + $0x328] sm:$0xff] }
  0x28   :  { %390 = vmatprep.mubr.f32.mxu1 %v1913_v3  ;;  %1495 = vmatprep.subr.bf16.mxu0 %v1494_v53  ;;  %v131_v44 = vld [vmem:[%s4192_s2 + $0x2f0] sm:$0xff]  ;;  %v146_v48 = vld [vmem:[%s4192_s2 + $0x368] sm:$0xff]  ;;  %v1512_v50 = vpack.c.bf16 %v129_v41, %v121_v40  ;;  %v140_v51 = vld [vmem:[%s4192_s2 + $0x338] sm:$0xff] }
  0x29   :  { %278 = vmatmul.mubr.f32.gmra.mrb[2].mxu0 %v2223_v59  ;;  %1527 = vmatprep.subr.bf16.mxu1 %v1526_v56  ;;  %v2355_v49 = vld [vmem:[%s4196_s1 + $0x28] sm:$0xff]  ;;  %v148_v52 = vld [vmem:[%s4192_s2 + $0x378] sm:$0xff]  ;;  %v1544_v53 = vpack.c.bf16 %v131_v44, %v123_v43  ;;  %v137_v54 = vld [vmem:[%s4192_s2 + $0x320] sm:$0xff]  ;;  %v1514_v56 = vpack.c.bf16 %v146_v48, %v138_v47 }
  0x2a   :  { %391 = vmatmul.mubr.f32.gmra.mrb[2].mxu1 %v2223_v59  ;;  %1497 = vmatpush1.bf16.msra.mxu0 %v1496_v60  ;;  %v145_v55 = vld [vmem:[%s4192_s2 + $0x360] sm:$0xff]  ;;  %v139_v57 = vld [vmem:[%s4192_s2 + $0x330] sm:$0xff]  ;;  %v1546_v60 = vpack.c.bf16 %v148_v52, %v140_v51  ;;  %v154_v61 = vld [vmem:[%s4192_s2 + $0x3a8] sm:$0xff] }
  0x2b   :  { %1529 = vmatpush1.bf16.msra.mxu1 %v1528_v63  ;;  %283 = vmatprep.mubr.f32.mxu0 %v1913_v3  ;;  %v147_v58 = vld [vmem:[%s4192_s2 + $0x370] sm:$0xff]  ;;  %v162_v62 = vld [vmem:[%s4192_s2 + $0x3e8] sm:$0xff]  ;;  %v1516_v0 = vpack.c.bf16 %v145_v55, %v137_v54  ;;  %v156_v1 = vld [vmem:[%s4192_s2 + $0x3b8] sm:$0xff] }
  0x2c   :  { %396 = vmatprep.mubr.f32.mxu1 %v1913_v3  ;;  %1499 = vmatprep.subr.bf16.mxu0 %v1498_v2  ;;  %v35_v63 = vld [vmem:[%s4196_s1 + $0x30] sm:$0xff]  ;;  %v164_v2 = vld [vmem:[%s4192_s2 + $0x3f8] sm:$0xff]  ;;  %v1548_v4 = vpack.c.bf16 %v147_v58, %v139_v57  ;;  %v153_v5 = vld [vmem:[%s4192_s2 + $0x3a0] sm:$0xff]  ;;  %v1518_v7 = vpack.c.bf16 %v162_v62, %v154_v61 }
  0x2d   :  { %284 = vmatmul.mubr.f32.gmra.mrb[4].mxu0 %v2256_v9  ;;  %1531 = vmatprep.subr.bf16.mxu1 %v1530_v6  ;;  %v161_v6 = vld [vmem:[%s4192_s2 + $0x3e0] sm:$0xff]  ;;  %v155_v8 = vld [vmem:[%s4192_s2 + $0x3b0] sm:$0xff]  ;;  %v1550_v11 = vpack.c.bf16 %v164_v2, %v156_v1  ;;  %v36_v12 = vld [vmem:[%s4196_s1 + $0x38] sm:$0xff] }
  0x2e   :  { %397 = vmatmul.mubr.f32.gmra.mrb[4].mxu1 %v2256_v9  ;;  %1501 = vmatpush1.bf16.msra.mxu0 %v1500_v10  ;;  %v163_v10 = vld [vmem:[%s4192_s2 + $0x3f0] sm:$0xff]  ;;  %v2464_v15 = vld [vmem:[%s4197_s4 + $0x20] sm:$0xff]  ;;  %v2479_v18 = vld [vmem:[%s4197_s4 + $0x38] sm:$0xff] }
  0x2f   :  { %1533 = vmatpush1.bf16.msra.mxu1 %v1532_v13  ;;  %289 = vmatprep.mubr.f32.mxu0 %v1913_v3  ;;  %v1520_v13 = vpack.c.bf16 %v161_v6, %v153_v5  ;;  %v1552_v14 = vpack.c.bf16 %v163_v10, %v155_v8  ;;  %4203 = vst [vmem:[#allocation3_spill] sm:$0xff] %v2464_v15  ;;  %v2474_v17 = vld [vmem:[%s4197_s4 + $0x30] sm:$0xff]  ;;  %4206 = vst [vmem:[#allocation6_spill] sm:$0xff] %v2479_v18  ;;  %v2489_v20 = vld [vmem:[%s4197_s4 + $0x48] sm:$0xff] }
  0x30   :  { %402 = vmatprep.mubr.f32.mxu1 %v1913_v3  ;;  %1503 = vmatprep.subr.bf16.mxu0 %v1502_v16  ;;  %v2469_v16 = vld [vmem:[%s4197_s4 + $0x28] sm:$0xff]  ;;  %4205 = vst [vmem:[#allocation5_spill] sm:$0xff] %v2474_v17  ;;  %v2494_v21 = vld [vmem:[%s4197_s4 + $0x50] sm:$0xff]  ;;  %v2524_v27 = vld [vmem:[%s4197_s4 + $0x80] sm:$0xff] }
  0x31   :  { %290 = vmatmul.mubr.f32.gmra.mrb[6].mxu0 %v2289_v22  ;;  %1535 = vmatprep.subr.bf16.mxu1 %v1534_v19  ;;  %4204 = vst [vmem:[#allocation4_spill] sm:$0xff] %v2469_v16  ;;  %v2484_v19 = vld [vmem:[%s4197_s4 + $0x40] sm:$0xff]  ;;  %v2509_v24 = vld [vmem:[%s4197_s4 + $0x68] sm:$0xff]  ;;  %v2514_v25 = vld [vmem:[%s4197_s4 + $0x70] sm:$0xff] }
  0x32   :  { %403 = vmatmul.mubr.f32.gmra.mrb[6].mxu1 %v2289_v22  ;;  %1505 = vmatpush1.bf16.msra.mxu0 %v1504_v23  ;;  %v2504_v23 = vld [vmem:[%s4197_s4 + $0x60] sm:$0xff]  ;;  %4208 = vst [vmem:[#allocation8_spill] sm:$0xff] %v2509_v24  ;;  %4209 = vst [vmem:[#allocation9_spill] sm:$0xff] %v2514_v25  ;;  %v2529_v28 = vld [vmem:[%s4197_s4 + $0x88] sm:$0xff] }
  0x33   :  { %1537 = vmatpush1.bf16.msra.mxu1 %v1536_v26  ;;  %295 = vmatprep.mubr.f32.mxu0 %v1913_v3  ;;  %4207 = vst [vmem:[#allocation7_spill] sm:$0xff] %v2504_v23  ;;  %v2519_v26 = vld [vmem:[%s4197_s4 + $0x78] sm:$0xff]  ;;  %v2544_v31 = vld [vmem:[%s4197_s4 + $0xa0] sm:$0xff]  ;;  %v2554_v33 = vld [vmem:[%s4197_s4 + $0xb0] sm:$0xff] }
  0x34   :  { %408 = vmatprep.mubr.f32.mxu1 %v1913_v3  ;;  %1507 = vmatprep.subr.bf16.mxu0 %v1506_v29  ;;  %4210 = vst [vmem:[#allocation10_spill] sm:$0xff] %v2519_v26  ;;  %v2534_v29 = vld [vmem:[%s4197_s4 + $0x90] sm:$0xff]  ;;  %v2539_v30 = vld [vmem:[%s4197_s4 + $0x98] sm:$0xff]  ;;  %4211 = vst [vmem:[#allocation11_spill] sm:$0xff] %v2544_v31 }
  0x35   :  { %296 = vmatmul.mubr.f32.gmra.mrb[8].mxu0 %v2322_v35  ;;  %1539 = vmatprep.subr.bf16.mxu1 %v1538_v32  ;;  %v2549_v32 = vld [vmem:[%s4197_s4 + $0xa8] sm:$0xff]  ;;  %4213 = vst [vmem:[#allocation13_spill] sm:$0xff] %v2554_v33  ;;  %v2559_v34 = vld [vmem:[%s4197_s4 + $0xb8] sm:$0xff]  ;;  %v2574_v37 = vld [vmem:[%s4197_s4 + $0xd0] sm:$0xff] }
  0x36   :  { %409 = vmatmul.mubr.f32.gmra.mrb[8].mxu1 %v2322_v35  ;;  %1509 = vmatpush1.bf16.msra.mxu0 %v1508_v36  ;;  %4212 = vst [vmem:[#allocation12_spill] sm:$0xff] %v2549_v32  ;;  %4214 = vst [vmem:[#allocation14_spill] sm:$0xff] %v2559_v34  ;;  %v2569_v36 = vld [vmem:[%s4197_s4 + $0xc8] sm:$0xff]  ;;  %v2579_v38 = vld [vmem:[%s4197_s4 + $0xd8] sm:$0xff] }
  0x37   :  { %1541 = vmatpush1.bf16.msra.mxu1 %v1540_v39  ;;  %301 = vmatprep.mubr.f32.mxu0 %v1913_v3  ;;  %v2584_v39 = vld [vmem:[%s4197_s4 + $0xe0] sm:$0xff]  ;;  %v2589_v40 = vld [vmem:[%s4197_s4 + $0xe8] sm:$0xff]  ;;  %v2594_v41 = vld [vmem:[%s4197_s4 + $0xf0] sm:$0xff] }
  0x38   :  { %414 = vmatprep.mubr.f32.mxu1 %v1913_v3  ;;  %1511 = vmatprep.subr.bf16.mxu0 %v1510_v42  ;;  %4215 = vst [vmem:[#allocation15_spill] sm:$0xff] %v2584_v39  ;;  %4216 = vst [vmem:[#allocation16_spill] sm:$0xff] %v2589_v40  ;;  %v2599_v42 = vld [vmem:[%s4197_s4 + $0xf8] sm:$0xff]  ;;  %v2604_v43 = vld [vmem:[%s4197_s4 + $0x100] sm:$0xff] }
  0x39   :  { %302 = vmatmul.mubr.f32.gmra.mrb[10].mxu0 %v2355_v49  ;;  %1543 = vmatprep.subr.bf16.mxu1 %v1542_v45  ;;  %4217 = vst [vmem:[#allocation17_spill] sm:$0xff] %v2594_v41  ;;  %4218 = vst [vmem:[#allocation18_spill] sm:$0xff] %v2599_v42  ;;  %v2609_v44 = vld [vmem:[%s4197_s4 + $0x108] sm:$0xff]  ;;  %v2614_v45 = vld [vmem:[%s4197_s4 + $0x110] sm:$0xff] }
  0x3a   :  { %415 = vmatmul.mubr.f32.gmra.mrb[10].mxu1 %v2355_v49  ;;  %1513 = vmatpush1.bf16.msra.mxu0 %v1512_v50  ;;  %v2619_v47 = vld [vmem:[%s4197_s4 + $0x118] sm:$0xff]  ;;  %v2624_v48 = vld [vmem:[%s4197_s4 + $0x120] sm:$0xff]  ;;  %v2634_v50 = vld [vmem:[%s4197_s4 + $0x130] sm:$0xff] }
  0x3b   :  { %1545 = vmatpush1.bf16.msra.mxu1 %v1544_v53  ;;  %307 = vmatprep.mubr.f32.mxu0 %v1913_v3  ;;  %4219 = vst [vmem:[#allocation19_spill] sm:$0xff] %v2624_v48  ;;  %4221 = vst [vmem:[#allocation21_spill] sm:$0xff] %v2634_v50  ;;  %v2639_v51 = vld [vmem:[%s4197_s4 + $0x138] sm:$0xff]  ;;  %v2644_v52 = vld [vmem:[%s4197_s4 + $0x140] sm:$0xff] }
  0x3c   :  { %420 = vmatprep.mubr.f32.mxu1 %v1913_v3  ;;  %1515 = vmatprep.subr.bf16.mxu0 %v1514_v56  ;;  %4222 = vst [vmem:[#allocation22_spill] sm:$0xff] %v2639_v51  ;;  %v2649_v53 = vld [vmem:[%s4197_s4 + $0x148] sm:$0xff]  ;;  %v2654_v54 = vld [vmem:[%s4197_s4 + $0x150] sm:$0xff]  ;;  %v2659_v55 = vld [vmem:[%s4197_s4 + $0x158] sm:$0xff] }
  0x3d   :  { %308 = vmatmul.mubr.f32.gmra.mrb[12].mxu0 %v35_v63  ;;  %1547 = vmatprep.subr.bf16.mxu1 %v1546_v60  ;;  %v2664_v56 = vld [vmem:[%s4197_s4 + $0x160] sm:$0xff]  ;;  %v2669_v57 = vld [vmem:[%s4197_s4 + $0x168] sm:$0xff]  ;;  %v2674_v58 = vld [vmem:[%s4197_s4 + $0x170] sm:$0xff] }
  0x3e   :  { %421 = vmatmul.mubr.f32.gmra.mrb[12].mxu1 %v35_v63  ;;  %1517 = vmatpush1.bf16.msra.mxu0 %v1516_v0  ;;  %4223 = vst [vmem:[#allocation23_spill] sm:$0xff] %v2664_v56  ;;  %4224 = vst [vmem:[#allocation24_spill] sm:$0xff] %v2669_v57  ;;  %v2679_v60 = vld [vmem:[%s4197_s4 + $0x178] sm:$0xff]  ;;  %v2684_v61 = vld [vmem:[%s4197_s4 + $0x180] sm:$0xff] }
  0x3f   :  { %1549 = vmatpush1.bf16.msra.mxu1 %v1548_v4  ;;  %313 = vmatprep.mubr.f32.mxu0 %v1913_v3  ;;  %4225 = vst [vmem:[#allocation25_spill] sm:$0xff] %v2674_v58  ;;  %4226 = vst [vmem:[#allocation26_spill] sm:$0xff] %v2679_v60  ;;  %v2689_v62 = vld [vmem:[%s4197_s4 + $0x188] sm:$0xff]  ;;  %v2699_v0 = vld [vmem:[%s4197_s4 + $0x198] sm:$0xff] }
  0x40   :  { %426 = vmatprep.mubr.f32.mxu1 %v1913_v3  ;;  %1519 = vmatprep.subr.bf16.mxu0 %v1518_v7  ;;  %v2704_v1 = vld [vmem:[%s4197_s4 + $0x1a0] sm:$0xff]  ;;  %v2709_v2 = vld [vmem:[%s4197_s4 + $0x1a8] sm:$0xff]  ;;  %v2714_v4 = vld [vmem:[%s4197_s4 + $0x1b0] sm:$0xff] }
  0x41   :  { %314 = vmatmul.mubr.f32.gmra.mrb[14].mxu0 %v36_v12  ;;  %1551 = vmatprep.subr.bf16.mxu1 %v1550_v11  ;;  %4227 = vst [vmem:[#allocation27_spill] sm:$0xff] %v2704_v1  ;;  %4228 = vst [vmem:[#allocation28_spill] sm:$0xff] %v2709_v2  ;;  %v2719_v5 = vld [vmem:[%s4197_s4 + $0x1b8] sm:$0xff]  ;;  %v2724_v6 = vld [vmem:[%s4197_s4 + $0x1c0] sm:$0xff] }
  0x42   :  { %427 = vmatmul.mubr.f32.gmra.mrb[14].mxu1 %v36_v12  ;;  %1521 = vmatpush1.bf16.msra.mxu0 %v1520_v13  ;;  %4229 = vst [vmem:[#allocation29_spill] sm:$0xff] %v2714_v4  ;;  %4230 = vst [vmem:[#allocation30_spill] sm:$0xff] %v2719_v5  ;;  %v2729_v7 = vld [vmem:[%s4197_s4 + $0x1c8] sm:$0xff]  ;;  %v2734_v8 = vld [vmem:[%s4197_s4 + $0x1d0] sm:$0xff] }
  0x43   :  { %1553 = vmatpush1.bf16.msra.mxu1 %v1552_v14  ;;  %497 = vmatprep.mubr.f32.mxu0 %v1913_v3  ;;  %v2739_v10 = vld [vmem:[%s4197_s4 + $0x1d8] sm:$0xff]  ;;  %v2744_v11 = vld [vmem:[%s4197_s4 + $0x1e0] sm:$0xff]  ;;  %v2754_v13 = vld [vmem:[%s4197_s4 + $0x1f0] sm:$0xff] }
  0x44   :  { %610 = vmatprep.mubr.f32.mxu1 %v1913_v3  ;;  %4231 = vst [vmem:[#allocation31_spill] sm:$0xff] %v2744_v11  ;;  %4233 = vst [vmem:[#allocation33_spill] sm:$0xff] %v2754_v13  ;;  %v2759_v14 = vld [vmem:[%s4197_s4 + $0x1f8] sm:$0xff]  ;;  %v2764_v4 = vld [vmem:[%s4197_s4 + $0x200] sm:$0xff] }
  0x45   :  { %498 = vmatmul.mubr.f32.vlgmr.msra.gmra.mrb[16].mxu0 %v2192_v46  ;;  %4234 = vst [vmem:[#allocation34_spill] sm:$0xff] %v2759_v14  ;;  %v2769_v11 = vld [vmem:[%s4197_s4 + $0x208] sm:$0xff]  ;;  %v2774_v1 = vld [vmem:[%s4197_s4 + $0x210] sm:$0xff]  ;;  %v2779_v13 = vld [vmem:[%s4197_s4 + $0x218] sm:$0xff] }
  0x46   :  { %611 = vmatmul.mubr.f32.vlgmr.msra.gmra.mrb[16].mxu1 %v2192_v46  ;;  %503 = vmatprep.mubr.f32.mxu0 %v1913_v3  ;;  %v2444_v46 = vld [vmem:[%s4197_s4] sm:$0xff]  ;;  %4235 = vst [vmem:[#allocation35_spill] sm:$0xff] %v2774_v1  ;;  %v2789_v5 = vld [vmem:[%s4197_s4 + $0x228] sm:$0xff]  ;;  %v2794_v58 = vld [vmem:[%s4197_s4 + $0x230] sm:$0xff] }
  0x47   :  { %616 = vmatprep.mubr.f32.mxu1 %v1913_v3  ;;  %v2784_v14 = vld [vmem:[%s4197_s4 + $0x220] sm:$0xff]  ;;  %4237 = vst [vmem:[#allocation37_spill] sm:$0xff] %v2789_v5  ;;  %4238 = vst [vmem:[#allocation38_spill] sm:$0xff] %v2794_v58  ;;  %v2799_v50 = vld [vmem:[%s4197_s4 + $0x238] sm:$0xff] }
  0x48   :  { %4236 = vst [vmem:[#allocation36_spill] sm:$0xff] %v2784_v14  ;;  %4239 = vst [vmem:[#allocation39_spill] sm:$0xff] %v2799_v50  ;;  %v2809_v14 = vld [vmem:[%s4197_s4 + $0x248] sm:$0xff]  ;;  %v2814_v5 = vld [vmem:[%s4197_s4 + $0x250] sm:$0xff] }
  0x49   :  { %504 = vmatmul.mubr.f32.gmra.mrb[18].mxu0 %v2223_v59  ;;  %4240 = vst [vmem:[#allocation40_spill] sm:$0xff] %v2814_v5  ;;  %v2819_v58 = vld [vmem:[%s4197_s4 + $0x258] sm:$0xff]  ;;  %v2824_v50 = vld [vmem:[%s4197_s4 + $0x260] sm:$0xff]  ;;  %v2829_v2 = vld [vmem:[%s4197_s4 + $0x268] sm:$0xff] }
  0x4a   :  { %617 = vmatmul.mubr.f32.gmra.mrb[18].mxu1 %v2223_v59  ;;  %509 = vmatprep.mubr.f32.mxu0 %v1913_v3  ;;  %v2449_v59 = vld [vmem:[%s4197_s4 + $0x8] sm:$0xff]  ;;  %4241 = vst [vmem:[#allocation41_spill] sm:$0xff] %v2824_v50  ;;  %4242 = vst [vmem:[#allocation42_spill] sm:$0xff] %v2829_v2  ;;  %v2834_v56 = vld [vmem:[%s4197_s4 + $0x270] sm:$0xff] }
  0x4b   :  { %622 = vmatprep.mubr.f32.mxu1 %v1913_v3  ;;  %4243 = vst [vmem:[#allocation43_spill] sm:$0xff] %v2834_v56  ;;  %v2839_v48 = vld [vmem:[%s4197_s4 + $0x278] sm:$0xff]  ;;  %v2844_v60 = vld [vmem:[%s4197_s4 + $0x280] sm:$0xff]  ;;  %v2849_v50 = vld [vmem:[%s4197_s4 + $0x288] sm:$0xff] }
  0x4c   :  { %4244 = vst [vmem:[#allocation44_spill] sm:$0xff] %v2839_v48  ;;  %4245 = vst [vmem:[#allocation45_spill] sm:$0xff] %v2844_v60  ;;  %v2854_v2 = vld [vmem:[%s4197_s4 + $0x290] sm:$0xff]  ;;  %v2859_v56 = vld [vmem:[%s4197_s4 + $0x298] sm:$0xff] }
  0x4d   :  { %510 = vmatmul.mubr.f32.gmra.mrb[20].mxu0 %v2256_v9  ;;  %4246 = vst [vmem:[#allocation46_spill] sm:$0xff] %v2849_v50  ;;  %4247 = vst [vmem:[#allocation47_spill] sm:$0xff] %v2854_v2  ;;  %v2864_v48 = vld [vmem:[%s4197_s4 + $0x2a0] sm:$0xff]  ;;  %v2869_v51 = vld [vmem:[%s4197_s4 + $0x2a8] sm:$0xff] }
  0x4e   :  { %623 = vmatmul.mubr.f32.gmra.mrb[20].mxu1 %v2256_v9  ;;  %515 = vmatprep.mubr.f32.mxu0 %v1913_v3  ;;  %v2454_v9 = vld [vmem:[%s4197_s4 + $0x10] sm:$0xff]  ;;  %4248 = vst [vmem:[#allocation48_spill] sm:$0xff] %v2859_v56  ;;  %4249 = vst [vmem:[#allocation49_spill] sm:$0xff] %v2864_v48  ;;  %v2879_v33 = vld [vmem:[%s4197_s4 + $0x2b8] sm:$0xff] }
  0x4f   :  { %628 = vmatprep.mubr.f32.mxu1 %v1913_v3  ;;  %4250 = vst [vmem:[#allocation50_spill] sm:$0xff] %v2869_v51  ;;  %v2874_v41 = vld [vmem:[%s4197_s4 + $0x2b0] sm:$0xff]  ;;  %4252 = vst [vmem:[#allocation52_spill] sm:$0xff] %v2879_v33  ;;  %v2884_v57 = vld [vmem:[%s4197_s4 + $0x2c0] sm:$0xff] }
  0x50   :  { %4251 = vst [vmem:[#allocation51_spill] sm:$0xff] %v2874_v41  ;;  %4253 = vst [vmem:[#allocation53_spill] sm:$0xff] %v2884_v57  ;;  %v2889_v48 = vld [vmem:[%s4197_s4 + $0x2c8] sm:$0xff]  ;;  %v2894_v51 = vld [vmem:[%s4197_s4 + $0x2d0] sm:$0xff] }
  0x51   :  { %516 = vmatmul.mubr.f32.gmra.mrb[22].mxu0 %v2289_v22  ;;  %4254 = vst [vmem:[#allocation54_spill] sm:$0xff] %v2889_v48  ;;  %4255 = vst [vmem:[#allocation55_spill] sm:$0xff] %v2894_v51  ;;  %v2899_v41 = vld [vmem:[%s4197_s4 + $0x2d8] sm:$0xff]  ;;  %v2904_v33 = vld [vmem:[%s4197_s4 + $0x2e0] sm:$0xff] }
  0x52   :  { %629 = vmatmul.mubr.f32.gmra.mrb[22].mxu1 %v2289_v22  ;;  %521 = vmatprep.mubr.f32.mxu0 %v1913_v3  ;;  %v2499_v22 = vld [vmem:[%s4197_s4 + $0x58] sm:$0xff]  ;;  %4256 = vst [vmem:[#allocation56_spill] sm:$0xff] %v2899_v41  ;;  %4257 = vst [vmem:[#allocation57_spill] sm:$0xff] %v2904_v33  ;;  %v2914_v39 = vld [vmem:[%s4197_s4 + $0x2f0] sm:$0xff] }
  0x53   :  { %634 = vmatprep.mubr.f32.mxu1 %v1913_v3  ;;  %4259 = vst [vmem:[#allocation59_spill] sm:$0xff] %v2914_v39  ;;  %v2919_v31 = vld [vmem:[%s4197_s4 + $0x2f8] sm:$0xff]  ;;  %v2924_v42 = vld [vmem:[%s4197_s4 + $0x300] sm:$0xff]  ;;  %v2929_v33 = vld [vmem:[%s4197_s4 + $0x308] sm:$0xff] }
  0x54   :  { %4260 = vst [vmem:[#allocation60_spill] sm:$0xff] %v2919_v31  ;;  %4261 = vst [vmem:[#allocation61_spill] sm:$0xff] %v2924_v42  ;;  %v2939_v39 = vld [vmem:[%s4197_s4 + $0x318] sm:$0xff]  ;;  %v2944_v31 = vld [vmem:[%s4197_s4 + $0x320] sm:$0xff] }
  0x55   :  { %522 = vmatmul.mubr.f32.gmra.mrb[24].mxu0 %v2322_v35  ;;  %4262 = vst [vmem:[#allocation62_spill] sm:$0xff] %v2929_v33  ;;  %4264 = vst [vmem:[#allocation64_spill] sm:$0xff] %v2939_v39  ;;  %v2949_v34 = vld [vmem:[%s4197_s4 + $0x328] sm:$0xff]  ;;  %v2954_v25 = vld [vmem:[%s4197_s4 + $0x330] sm:$0xff] }
  0x56   :  { %635 = vmatmul.mubr.f32.gmra.mrb[24].mxu1 %v2322_v35  ;;  %527 = vmatprep.mubr.f32.mxu0 %v1913_v3  ;;  %v2564_v35 = vld [vmem:[%s4197_s4 + $0xc0] sm:$0xff]  ;;  %4265 = vst [vmem:[#allocation65_spill] sm:$0xff] %v2944_v31  ;;  %4266 = vst [vmem:[#allocation66_spill] sm:$0xff] %v2949_v34  ;;  %v2959_v17 = vld [vmem:[%s4197_s4 + $0x338] sm:$0xff] }
  0x57   :  { %640 = vmatprep.mubr.f32.mxu1 %v1913_v3  ;;  %4267 = vst [vmem:[#allocation67_spill] sm:$0xff] %v2954_v25  ;;  %4268 = vst [vmem:[#allocation68_spill] sm:$0xff] %v2959_v17  ;;  %v2964_v40 = vld [vmem:[%s4197_s4 + $0x340] sm:$0xff]  ;;  %v2969_v31 = vld [vmem:[%s4197_s4 + $0x348] sm:$0xff] }
  0x58   :  { %4269 = vst [vmem:[#allocation69_spill] sm:$0xff] %v2964_v40  ;;  %4270 = vst [vmem:[#allocation70_spill] sm:$0xff] %v2969_v31  ;;  %v2974_v34 = vld [vmem:[%s4197_s4 + $0x350] sm:$0xff]  ;;  %v2979_v25 = vld [vmem:[%s4197_s4 + $0x358] sm:$0xff] }
  0x59   :  { %528 = vmatmul.mubr.f32.gmra.mrb[26].mxu0 %v2355_v49  ;;  %4271 = vst [vmem:[#allocation71_spill] sm:$0xff] %v2974_v34  ;;  %4272 = vst [vmem:[#allocation72_spill] sm:$0xff] %v2979_v25  ;;  %v2984_v17 = vld [vmem:[%s4197_s4 + $0x360] sm:$0xff]  ;;  %v2989_v32 = vld [vmem:[%s4197_s4 + $0x368] sm:$0xff] }
  0x5a   :  { %641 = vmatmul.mubr.f32.gmra.mrb[26].mxu1 %v2355_v49  ;;  %533 = vmatprep.mubr.f32.mxu0 %v1913_v3  ;;  %v2629_v49 = vld [vmem:[%s4197_s4 + $0x128] sm:$0xff]  ;;  %4273 = vst [vmem:[#allocation73_spill] sm:$0xff] %v2984_v17  ;;  %4274 = vst [vmem:[#allocation74_spill] sm:$0xff] %v2989_v32  ;;  %v2994_v23 = vld [vmem:[%s4197_s4 + $0x370] sm:$0xff] }
  0x5b   :  { %646 = vmatprep.mubr.f32.mxu1 %v1913_v3  ;;  %4220 = vst [vmem:[#allocation20_spill] sm:$0xff] %v2629_v49  ;;  %v2909_v49 = vld [vmem:[%s4197_s4 + $0x2e8] sm:$0xff]  ;;  %4275 = vst [vmem:[#allocation75_spill] sm:$0xff] %v2994_v23  ;;  %v2999_v15 = vld [vmem:[%s4197_s4 + $0x378] sm:$0xff] }
  0x5c   :  { %4258 = vst [vmem:[#allocation58_spill] sm:$0xff] %v2909_v49  ;;  %v2934_v49 = vld [vmem:[%s4197_s4 + $0x310] sm:$0xff]  ;;  %4276 = vst [vmem:[#allocation76_spill] sm:$0xff] %v2999_v15  ;;  %v3004_v26 = vld [vmem:[%s4197_s4 + $0x380] sm:$0xff] }
  0x5d   :  { %534 = vmatmul.mubr.f32.gmra.mrb[28].mxu0 %v35_v63  ;;  %4263 = vst [vmem:[#allocation63_spill] sm:$0xff] %v2934_v49  ;;  %4277 = vst [vmem:[#allocation77_spill] sm:$0xff] %v3004_v26  ;;  %v3009_v17 = vld [vmem:[%s4197_s4 + $0x388] sm:$0xff]  ;;  %v3014_v32 = vld [vmem:[%s4197_s4 + $0x390] sm:$0xff] }
  0x5e   :  { %647 = vmatmul.mubr.f32.gmra.mrb[28].mxu1 %v35_v63  ;;  %539 = vmatprep.mubr.f32.mxu0 %v1913_v3  ;;  %v2694_v63 = vld [vmem:[%s4197_s4 + $0x190] sm:$0xff]  ;;  %4278 = vst [vmem:[#allocation78_spill] sm:$0xff] %v3009_v17  ;;  %4279 = vst [vmem:[#allocation79_spill] sm:$0xff] %v3014_v32  ;;  %v3019_v23 = vld [vmem:[%s4197_s4 + $0x398] sm:$0xff] }
  0x5f   :  { %652 = vmatprep.mubr.f32.mxu1 %v1913_v3  ;;  %v2459_v3 = vld [vmem:[%s4197_s4 + $0x18] sm:$0xff]  ;;  %4280 = vst [vmem:[#allocation80_spill] sm:$0xff] %v3019_v23  ;;  %v3024_v15 = vld [vmem:[%s4197_s4 + $0x3a0] sm:$0xff]  ;;  %v3029_v18 = vld [vmem:[%s4197_s4 + $0x3a8] sm:$0xff] }
  0x60   :  { %4281 = vst [vmem:[#allocation81_spill] sm:$0xff] %v3024_v15  ;;  %4282 = vst [vmem:[#allocation82_spill] sm:$0xff] %v3029_v18  ;;  %v3034_v24 = vld [vmem:[%s4197_s4 + $0x3b0] sm:$0xff]  ;;  %v3039_v16 = vld [vmem:[%s4197_s4 + $0x3b8] sm:$0xff] }
  0x61   :  { %540 = vmatmul.mubr.f32.gmra.mrb[30].mxu0 %v36_v12  ;;  %4283 = vst [vmem:[#allocation83_spill] sm:$0xff] %v3034_v24  ;;  %4284 = vst [vmem:[#allocation84_spill] sm:$0xff] %v3039_v16  ;;  %v3044_v32 = vld [vmem:[%s4197_s4 + $0x3c0] sm:$0xff]  ;;  %v3049_v15 = vld [vmem:[%s4197_s4 + $0x3c8] sm:$0xff] }
  0x62   :  { %653 = vmatmul.mubr.f32.gmra.mrb[30].mxu1 %v36_v12  ;;  %v2749_v12 = vld [vmem:[%s4197_s4 + $0x1e8] sm:$0xff]  ;;  %4285 = vst [vmem:[#allocation85_spill] sm:$0xff] %v3044_v32  ;;  %4286 = vst [vmem:[#allocation86_spill] sm:$0xff] %v3049_v15  ;;  %v3054_v18 = vld [vmem:[%s4197_s4 + $0x3d0] sm:$0xff] }
  0x63   :  { %4232 = vst [vmem:[#allocation32_spill] sm:$0xff] %v2749_v12  ;;  %v2804_v12 = vld [vmem:[%s4197_s4 + $0x240] sm:$0xff]  ;;  %4287 = vst [vmem:[#allocation87_spill] sm:$0xff] %v3054_v18  ;;  %v3059_v24 = vld [vmem:[%s4197_s4 + $0x3d8] sm:$0xff] }
  0x64   :  { %4288 = vst [vmem:[#allocation88_spill] sm:$0xff] %v3059_v24  ;;  %v3064_v16 = vld [vmem:[%s4197_s4 + $0x3e0] sm:$0xff]  ;;  %v3069_v32 = vld [vmem:[%s4197_s4 + $0x3e8] sm:$0xff]  ;;  %v3074_v26 = vld [vmem:[%s4197_s4 + $0x3f0] sm:$0xff] }
  0x65   :  { %4289 = vst [vmem:[#allocation89_spill] sm:$0xff] %v3064_v16  ;;  %4290 = vst [vmem:[#allocation90_spill] sm:$0xff] %v3069_v32  ;;  %v3079_v18 = vld [vmem:[%s4197_s4 + $0x3f8] sm:$0xff]  ;;  %v3084_v24 = vld [vmem:[%s4197_s4 + $0x400] sm:$0xff] }
  0x66   :  { %4291 = vst [vmem:[#allocation91_spill] sm:$0xff] %v3074_v26  ;;  %4292 = vst [vmem:[#allocation92_spill] sm:$0xff] %v3079_v18  ;;  %v3089_v16 = vld [vmem:[%s4197_s4 + $0x408] sm:$0xff]  ;;  %v3094_v32 = vld [vmem:[%s4197_s4 + $0x410] sm:$0xff] }
  0x67   :  { %4293 = vst [vmem:[#allocation93_spill] sm:$0xff] %v3084_v24  ;;  %4294 = vst [vmem:[#allocation94_spill] sm:$0xff] %v3089_v16  ;;  %v3099_v26 = vld [vmem:[%s4197_s4 + $0x418] sm:$0xff]  ;;  %v3104_v18 = vld [vmem:[%s4197_s4 + $0x420] sm:$0xff] }
  0x68   :  { %4295 = vst [vmem:[#allocation95_spill] sm:$0xff] %v3094_v32  ;;  %4296 = vst [vmem:[#allocation96_spill] sm:$0xff] %v3099_v26  ;;  %v3109_v24 = vld [vmem:[%s4197_s4 + $0x428] sm:$0xff]  ;;  %v3114_v16 = vld [vmem:[%s4197_s4 + $0x430] sm:$0xff] }
  0x69   :  { %4297 = vst [vmem:[#allocation97_spill] sm:$0xff] %v3104_v18  ;;  %4298 = vst [vmem:[#allocation98_spill] sm:$0xff] %v3109_v24  ;;  %v3119_v32 = vld [vmem:[%s4197_s4 + $0x438] sm:$0xff]  ;;  %v3124_v26 = vld [vmem:[%s4197_s4 + $0x440] sm:$0xff] }
  0x6a   :  { %4299 = vst [vmem:[#allocation99_spill] sm:$0xff] %v3114_v16  ;;  %4300 = vst [vmem:[#allocation100_spill] sm:$0xff] %v3119_v32  ;;  %v3129_v18 = vld [vmem:[%s4197_s4 + $0x448] sm:$0xff]  ;;  %v3134_v24 = vld [vmem:[%s4197_s4 + $0x450] sm:$0xff] }
  0x6b   :  { %4301 = vst [vmem:[#allocation101_spill] sm:$0xff] %v3124_v26  ;;  %4302 = vst [vmem:[#allocation102_spill] sm:$0xff] %v3129_v18  ;;  %v3139_v16 = vld [vmem:[%s4197_s4 + $0x458] sm:$0xff]  ;;  %v3144_v32 = vld [vmem:[%s4197_s4 + $0x460] sm:$0xff] }
  0x6c   :  { %4303 = vst [vmem:[#allocation103_spill] sm:$0xff] %v3134_v24  ;;  %4304 = vst [vmem:[#allocation104_spill] sm:$0xff] %v3139_v16  ;;  %v3149_v26 = vld [vmem:[%s4197_s4 + $0x468] sm:$0xff]  ;;  %v3154_v18 = vld [vmem:[%s4197_s4 + $0x470] sm:$0xff]  ;;  %v167_v16 = vlaneseq }
  0x6d   :  { %4305 = vst [vmem:[#allocation105_spill] sm:$0xff] %v3144_v32  ;;  %4306 = vst [vmem:[#allocation106_spill] sm:$0xff] %v3149_v26  ;;  %v3159_v24 = vld [vmem:[%s4197_s4 + $0x478] sm:$0xff]  ;;  %v3164_v32 = vld [vmem:[%s4197_s4 + $0x480] sm:$0xff] }
  0x6e   :  { %4307 = vst [vmem:[#allocation107_spill] sm:$0xff] %v3154_v18  ;;  %4308 = vst [vmem:[#allocation108_spill] sm:$0xff] %v3159_v24  ;;  %v3169_v26 = vld [vmem:[%s4197_s4 + $0x488] sm:$0xff]  ;;  %v3174_v18 = vld [vmem:[%s4197_s4 + $0x490] sm:$0xff] }
  0x6f   :  { %4309 = vst [vmem:[#allocation109_spill] sm:$0xff] %v3164_v32  ;;  %4310 = vst [vmem:[#allocation110_spill] sm:$0xff] %v3169_v26  ;;  %v3179_v24 = vld [vmem:[%s4197_s4 + $0x498] sm:$0xff]  ;;  %v3184_v23 = vld [vmem:[%s4197_s4 + $0x4a0] sm:$0xff] }
  0x70   :  { %4311 = vst [vmem:[#allocation111_spill] sm:$0xff] %v3174_v18  ;;  %4312 = vst [vmem:[#allocation112_spill] sm:$0xff] %v3179_v24  ;;  %v3189_v32 = vld [vmem:[%s4197_s4 + $0x4a8] sm:$0xff]  ;;  %v3194_v26 = vld [vmem:[%s4197_s4 + $0x4b0] sm:$0xff] }
  0x71   :  { %4313 = vst [vmem:[#allocation113_spill] sm:$0xff] %v3184_v23  ;;  %4314 = vst [vmem:[#allocation114_spill] sm:$0xff] %v3189_v32  ;;  %v3199_v18 = vld [vmem:[%s4197_s4 + $0x4b8] sm:$0xff]  ;;  %v3204_v24 = vld [vmem:[%s4197_s4 + $0x4c0] sm:$0xff] }
  0x72   :  { %4315 = vst [vmem:[#allocation115_spill] sm:$0xff] %v3194_v26  ;;  %4316 = vst [vmem:[#allocation116_spill] sm:$0xff] %v3199_v18  ;;  %v3209_v23 = vld [vmem:[%s4197_s4 + $0x4c8] sm:$0xff]  ;;  %v3214_v32 = vld [vmem:[%s4197_s4 + $0x4d0] sm:$0xff]  ;;  %v3221_v18 = vshrl.u32 %v167_v16, 7 }
  0x73   :  { %4317 = vst [vmem:[#allocation117_spill] sm:$0xff] %v3204_v24  ;;  %4318 = vst [vmem:[#allocation118_spill] sm:$0xff] %v3209_v23  ;;  %v3219_v26 = vld [vmem:[%s4197_s4 + $0x4d8] sm:$0xff]  ;;  %v3226_v24 = vld [vmem:[%s4197_s4 + $0x4e0] sm:$0xff] }
  0x74   :  { %4319 = vst [vmem:[#allocation119_spill] sm:$0xff] %v3214_v32  ;;  %4320 = vst [vmem:[#allocation120_spill] sm:$0xff] %v3219_v26  ;;  %v3231_v23 = vld [vmem:[%s4197_s4 + $0x4e8] sm:$0xff]  ;;  %v3236_v32 = vld [vmem:[%s4197_s4 + $0x4f0] sm:$0xff]  ;;  %v177_v49 = vsub.s32 2, %v3221_v18  ;;  %v185_v33 = vsub.s32 4, %v3221_v18 }
  0x75   :  { %4321 = vst [vmem:[#allocation121_spill] sm:$0xff] %v3226_v24  ;;  %4322 = vst [vmem:[#allocation122_spill] sm:$0xff] %v3231_v23  ;;  %v3241_v16 = vld [vmem:[%s4197_s4 + $0x4f8] sm:$0xff]  ;;  %v3246_v26 = vld [vmem:[%s4197_s4 + $0x500] sm:$0xff]  ;;  %v193_v56 = vsub.s32 6, %v3221_v18  ;;  %v189_v5 = vsub.s32 5, %v3221_v18 }
  0x76   :  { %4323 = vst [vmem:[#allocation123_spill] sm:$0xff] %v3236_v32  ;;  %4324 = vst [vmem:[#allocation124_spill] sm:$0xff] %v3241_v16  ;;  %v3251_v24 = vld [vmem:[%s4197_s4 + $0x508] sm:$0xff]  ;;  %v3256_v23 = vld [vmem:[%s4197_s4 + $0x510] sm:$0xff] }
  0x77   :  { %4325 = vst [vmem:[#allocation125_spill] sm:$0xff] %v3246_v26  ;;  %4326 = vst [vmem:[#allocation126_spill] sm:$0xff] %v3251_v24  ;;  %v3261_v32 = vld [vmem:[%s4197_s4 + $0x518] sm:$0xff]  ;;  %v3266_v16 = vld [vmem:[%s4197_s4 + $0x520] sm:$0xff] }
  0x78   :  { %4327 = vst [vmem:[#allocation127_spill] sm:$0xff] %v3256_v23  ;;  %4328 = vst [vmem:[#allocation128_spill] sm:$0xff] %v3261_v32  ;;  %v3271_v26 = vld [vmem:[%s4198_s3] sm:$0xff]  ;;  %v3276_v24 = vld [vmem:[%s4197_s4 + $0x528] sm:$0xff] }
  0x79   :  { %4329 = vst [vmem:[#allocation129_spill] sm:$0xff] %v3266_v16  ;;  %4330 = vst [vmem:[#allocation130_spill] sm:$0xff] %v3276_v24  ;;  %v3281_v23 = vld [vmem:[%s4197_s4 + $0x530] sm:$0xff]  ;;  %v3286_v32 = vld [vmem:[%s4197_s4 + $0x538] sm:$0xff]  ;;  %v169_v16 = vsub.s32 0, %v3221_v18 }
  0x7a   :  { %4331 = vst [vmem:[#allocation131_spill] sm:$0xff] %v3281_v23  ;;  %4332 = vst [vmem:[#allocation132_spill] sm:$0xff] %v3286_v32  ;;  %v3292_v34 = vld [vmem:[%s4197_s4 + $0x540] sm:$0xff]  ;;  %v3297_v24 = vld [vmem:[%s4197_s4 + $0x548] sm:$0xff]  ;;  %v173_v32 = vsub.s32 1, %v3221_v18 }
  0x7b   :  { %4333 = vst [vmem:[#allocation133_spill] sm:$0xff] %v3292_v34  ;;  %4334 = vst [vmem:[#allocation134_spill] sm:$0xff] %v3297_v24  ;;  %v3302_v23 = vld [vmem:[%s4197_s4 + $0x550] sm:$0xff]  ;;  %v3309_v15 = vld [vmem:[%s4197_s4 + $0x558] sm:$0xff] }
  0x7c   :  { %4335 = vst [vmem:[#allocation135_spill] sm:$0xff] %v3302_v23  ;;  %4336 = vst [vmem:[#allocation136_spill] sm:$0xff] %v3309_v15  ;;  %v3314_v34 = vld [vmem:[%s4197_s4 + $0x560] sm:$0xff]  ;;  %v3319_v24 = vld [vmem:[%s4197_s4 + $0x568] sm:$0xff]  ;;  %v181_v23 = vsub.s32 3, %v3221_v18 }
  0x7d   :  { %4337 = vst [vmem:[#allocation137_spill] sm:$0xff] %v3314_v34  ;;  %4338 = vst [vmem:[#allocation138_spill] sm:$0xff] %v3319_v24  ;;  %v3325_v17 = vld [vmem:[%s4197_s4 + $0x570] sm:$0xff]  ;;  %v3330_v15 = vld [vmem:[%s4197_s4 + $0x578] sm:$0xff] }
  0x7e   :  { %4339 = vst [vmem:[#allocation139_spill] sm:$0xff] %v3325_v17  ;;  %4340 = vst [vmem:[#allocation140_spill] sm:$0xff] %v3330_v15  ;;  %v3335_v34 = vld [vmem:[%s4197_s4 + $0x580] sm:$0xff]  ;;  %v3340_v24 = vld [vmem:[%s4197_s4 + $0x588] sm:$0xff]  ;;  %v3353_v15 = vrot.slane %v3271_v26, %v169_v16  ;;  %v3374_v16 = vrot.slane %v3271_v26, %v173_v32 }
  0x7f   :  { %4341 = vst [vmem:[#allocation141_spill] sm:$0xff] %v3335_v34  ;;  %4342 = vst [vmem:[#allocation142_spill] sm:$0xff] %v3340_v24  ;;  %v3345_v40 = vld [vmem:[%s4197_s4 + $0x590] sm:$0xff]  ;;  %v3350_v17 = vld [vmem:[%s4197_s4 + $0x598] sm:$0xff] }
  0x80   :  { %4343 = vst [vmem:[#allocation143_spill] sm:$0xff] %v3345_v40  ;;  %4344 = vst [vmem:[#allocation144_spill] sm:$0xff] %v3350_v17  ;;  %v3358_v34 = vld [vmem:[%s4197_s4 + $0x5a0] sm:$0xff]  ;;  %v3363_v24 = vld [vmem:[%s4197_s4 + $0x5a8] sm:$0xff]  ;;  %v3371_v17 = vrot.slane %v3271_v26, %v177_v49  ;;  %v3392_v49 = vrot.slane %v3271_v26, %v181_v23 }
  0x81   :  { %4345 = vst [vmem:[#allocation145_spill] sm:$0xff] %v3358_v34  ;;  %4346 = vst [vmem:[#allocation146_spill] sm:$0xff] %v3363_v24  ;;  %v3368_v40 = vld [vmem:[%s4197_s4 + $0x5b0] sm:$0xff]  ;;  %v3379_v34 = vld [vmem:[%s4197_s4 + $0x5b8] sm:$0xff] }
  0x82   :  { %4347 = vst [vmem:[#allocation147_spill] sm:$0xff] %v3368_v40  ;;  %4348 = vst [vmem:[#allocation148_spill] sm:$0xff] %v3379_v34  ;;  %v3384_v24 = vld [vmem:[%s4197_s4 + $0x5c0] sm:$0xff]  ;;  %v3389_v40 = vld [vmem:[%s4197_s4 + $0x5c8] sm:$0xff] }
  0x83   :  { %4349 = vst [vmem:[#allocation149_spill] sm:$0xff] %v3384_v24  ;;  %4350 = vst [vmem:[#allocation150_spill] sm:$0xff] %v3389_v40  ;;  %v3397_v32 = vld [vmem:[%s4197_s4 + $0x5d0] sm:$0xff]  ;;  %v3402_v34 = vld [vmem:[%s4197_s4 + $0x5d8] sm:$0xff] }
  0x84   :  { %4351 = vst [vmem:[#allocation151_spill] sm:$0xff] %v3397_v32  ;;  %4352 = vst [vmem:[#allocation152_spill] sm:$0xff] %v3402_v34  ;;  %v3407_v24 = vld [vmem:[%s4197_s4 + $0x5e0] sm:$0xff]  ;;  %v3412_v23 = vld [vmem:[%s4197_s4 + $0x5e8] sm:$0xff] }
  0x85   :  { %4353 = vst [vmem:[#allocation153_spill] sm:$0xff] %v3407_v24  ;;  %4354 = vst [vmem:[#allocation154_spill] sm:$0xff] %v3412_v23  ;;  %v3417_v32 = vld [vmem:[%s4197_s4 + $0x5f0] sm:$0xff]  ;;  %v3422_v34 = vld [vmem:[%s4197_s4 + $0x5f8] sm:$0xff] }
  0x86   :  { %4355 = vst [vmem:[#allocation155_spill] sm:$0xff] %v3417_v32  ;;  %4356 = vst [vmem:[#allocation156_spill] sm:$0xff] %v3422_v34  ;;  %v3428_v39 = vld [vmem:[%s4197_s4 + $0x600] sm:$0xff]  ;;  %v3433_v23 = vld [vmem:[%s4197_s4 + $0x608] sm:$0xff] }
  0x87   :  { %4357 = vst [vmem:[#allocation157_spill] sm:$0xff] %v3428_v39  ;;  %4358 = vst [vmem:[#allocation158_spill] sm:$0xff] %v3433_v23  ;;  %v3438_v32 = vld [vmem:[%s4197_s4 + $0x610] sm:$0xff]  ;;  %v3445_v2 = vld [vmem:[%s4197_s4 + $0x618] sm:$0xff] }
  0x88   :  { %4359 = vst [vmem:[#allocation159_spill] sm:$0xff] %v3438_v32  ;;  %4360 = vst [vmem:[#allocation160_spill] sm:$0xff] %v3445_v2  ;;  %v3450_v39 = vld [vmem:[%s4197_s4 + $0x620] sm:$0xff]  ;;  %v3455_v23 = vld [vmem:[%s4197_s4 + $0x628] sm:$0xff] }
  0x89   :  { %4361 = vst [vmem:[#allocation161_spill] sm:$0xff] %v3450_v39  ;;  %4362 = vst [vmem:[#allocation162_spill] sm:$0xff] %v3455_v23  ;;  %v3466_v32 = vld [vmem:[%s4197_s4 + $0x638] sm:$0xff]  ;;  %v3471_v39 = vld [vmem:[%s4197_s4 + $0x640] sm:$0xff] }
  0x8a   :  { %4364 = vst [vmem:[#allocation164_spill] sm:$0xff] %v3466_v32  ;;  %4365 = vst [vmem:[#allocation165_spill] sm:$0xff] %v3471_v39  ;;  %v3486_v32 = vld [vmem:[%s4197_s4 + $0x658] sm:$0xff]  ;;  %v3492_v39 = vld [vmem:[%s4197_s4 + $0x660] sm:$0xff] }
  0x8b   :  { %4368 = vst [vmem:[#allocation168_spill] sm:$0xff] %v3486_v32  ;;  %4369 = vst [vmem:[#allocation169_spill] sm:$0xff] %v3492_v39  ;;  %v3497_v2 = vld [vmem:[%s4197_s4 + $0x668] sm:$0xff]  ;;  %v3514_v39 = vld [vmem:[%s4197_s4 + $0x680] sm:$0xff] }
  0x8c   :  { %4370 = vst [vmem:[#allocation170_spill] sm:$0xff] %v3497_v2  ;;  %4373 = vst [vmem:[#allocation173_spill] sm:$0xff] %v3514_v39  ;;  %v3519_v2 = vld [vmem:[%s4197_s4 + $0x688] sm:$0xff]  ;;  %v3550_v39 = vld [vmem:[%s4197_s4 + $0x6b8] sm:$0xff] }
  0x8d   :  { %4374 = vst [vmem:[#allocation174_spill] sm:$0xff] %v3519_v2  ;;  %4380 = vst [vmem:[#allocation180_spill] sm:$0xff] %v3550_v39  ;;  %v3573_v2 = vld [vmem:[%s4197_s4 + $0x6d8] sm:$0xff] }
  0x8e   :  { %4384 = vst [vmem:[#allocation184_spill] sm:$0xff] %v3573_v2  ;;  %v3637_v2 = vld [vmem:[%s4197_s4 + $0x738] sm:$0xff] }
  0x8f   :  { %4396 = vst [vmem:[#allocation196_spill] sm:$0xff] %v3637_v2  ;;  %v3663_v2 = vld [vmem:[%s4197_s4 + $0x760] sm:$0xff] }
  0x90   :  { %4401 = vst [vmem:[#allocation201_spill] sm:$0xff] %v3663_v2 }
  0xf8   :  { %v273_v42 = vpop.f32.mrb[0].mxu0 }
  0xf9   :  { %v274_v40 = vadd.f32 %v273_v42, %v3353_v15  ;;  %v386_v25 = vpop.f32.mrb[0].mxu1  ;;  %v275_v24 = vpop.f32.mrb[1].mxu0 }
  0xfa   :  { %v387_v34 = vadd.f32 %v386_v25, %v3371_v17  ;;  %v276_v42 = vadd.f32 %v275_v24, %v3374_v16  ;;  %v388_v51 = vpop.f32.mrb[1].mxu1  ;;  %v3461_v24 = vld [vmem:[%s4197_s4 + $0x630] sm:$0xff] }
  0xfb   :  { %659 = vst [vmem:[#allocation2] sm:$0xff] %v274_v40  ;;  %v389_v25 = vadd.f32 %v388_v51, %v3392_v49  ;;  %4363 = vst [vmem:[#allocation163_spill] sm:$0xff] %v3461_v24  ;;  %v3476_v51 = vld [vmem:[%s4197_s4 + $0x648] sm:$0xff]  ;;  %v3481_v24 = vld [vmem:[%s4197_s4 + $0x650] sm:$0xff] }
  0xfc   :  { %661 = vst [vmem:[#allocation2 + $0x10] sm:$0xff] %v387_v34  ;;  %660 = vst [vmem:[#allocation2 + $0x8] sm:$0xff] %v276_v42  ;;  %v279_v40 = vpop.f32.mrb[2].mxu0 }
  0xfd   :  { %4366 = vst [vmem:[#allocation166_spill] sm:$0xff] %v3476_v51  ;;  %4367 = vst [vmem:[#allocation167_spill] sm:$0xff] %v3481_v24  ;;  %v280_v34 = vadd.f32 %v279_v40, %v3353_v15  ;;  %v392_v42 = vpop.f32.mrb[2].mxu1  ;;  %v281_v23 = vpop.f32.mrb[3].mxu0  ;;  %v3502_v24 = vld [vmem:[%s4197_s4 + $0x670] sm:$0xff]  ;;  %v3509_v51 = vld [vmem:[%s4197_s4 + $0x678] sm:$0xff] }
  0xfe   :  { %662 = vst [vmem:[#allocation2 + $0x18] sm:$0xff] %v389_v25  ;;  %4371 = vst [vmem:[#allocation171_spill] sm:$0xff] %v3502_v24  ;;  %v393_v25 = vadd.f32 %v392_v42, %v3371_v17  ;;  %v282_v40 = vadd.f32 %v281_v23, %v3374_v16  ;;  %v394_v32 = vpop.f32.mrb[3].mxu1  ;;  %v3525_v23 = vld [vmem:[%s4197_s4 + $0x690] sm:$0xff]  ;;  %v3530_v24 = vld [vmem:[%s4197_s4 + $0x698] sm:$0xff] }
  0xff   :  { %4372 = vst [vmem:[#allocation172_spill] sm:$0xff] %v3509_v51  ;;  %667 = vst [vmem:[#allocation2 + $0x40] sm:$0xff] %v280_v34  ;;  %v395_v42 = vadd.f32 %v394_v32, %v3392_v49  ;;  %v3535_v51 = vld [vmem:[%s4197_s4 + $0x6a0] sm:$0xff]  ;;  %v3540_v32 = vld [vmem:[%s4197_s4 + $0x6a8] sm:$0xff] }
 0x100   :  { %4375 = vst [vmem:[#allocation175_spill] sm:$0xff] %v3525_v23  ;;  %4376 = vst [vmem:[#allocation176_spill] sm:$0xff] %v3530_v24  ;;  %v285_v34 = vpop.f32.mrb[4].mxu0  ;;  %v3545_v23 = vld [vmem:[%s4197_s4 + $0x6b0] sm:$0xff]  ;;  %v3556_v24 = vld [vmem:[%s4197_s4 + $0x6c0] sm:$0xff] }
 0x101   :  { %4377 = vst [vmem:[#allocation177_spill] sm:$0xff] %v3535_v51  ;;  %669 = vst [vmem:[#allocation2 + $0x50] sm:$0xff] %v393_v25  ;;  %v286_v25 = vadd.f32 %v285_v34, %v3353_v15  ;;  %v287_v51 = vpop.f32.mrb[5].mxu0 }
 0x102   :  { %668 = vst [vmem:[#allocation2 + $0x48] sm:$0xff] %v282_v40  ;;  %4378 = vst [vmem:[#allocation178_spill] sm:$0xff] %v3540_v32  ;;  %v398_v40 = vpop.f32.mrb[4].mxu1  ;;  %v3561_v32 = vld [vmem:[%s4197_s4 + $0x6c8] sm:$0xff]  ;;  %v288_v34 = vadd.f32 %v287_v51, %v3374_v16  ;;  %v3589_v51 = vld [vmem:[%s4197_s4 + $0x6f0] sm:$0xff] }
 0x103   :  { %4379 = vst [vmem:[#allocation179_spill] sm:$0xff] %v3545_v23  ;;  %670 = vst [vmem:[#allocation2 + $0x58] sm:$0xff] %v395_v42  ;;  %v3566_v23 = vld [vmem:[%s4197_s4 + $0x6d0] sm:$0xff]  ;;  %v399_v42 = vadd.f32 %v398_v40, %v3371_v17  ;;  %v400_v39 = vpop.f32.mrb[5].mxu1 }
 0x104   :  { %4381 = vst [vmem:[#allocation181_spill] sm:$0xff] %v3556_v24  ;;  %4382 = vst [vmem:[#allocation182_spill] sm:$0xff] %v3561_v32  ;;  %v3578_v24 = vld [vmem:[%s4197_s4 + $0x6e0] sm:$0xff]  ;;  %v3583_v32 = vld [vmem:[%s4197_s4 + $0x6e8] sm:$0xff]  ;;  %v401_v40 = vadd.f32 %v400_v39, %v3392_v49 }
 0x105   :  { %4383 = vst [vmem:[#allocation183_spill] sm:$0xff] %v3566_v23  ;;  %4385 = vst [vmem:[#allocation185_spill] sm:$0xff] %v3578_v24  ;;  %v3594_v23 = vld [vmem:[%s4197_s4 + $0x6f8] sm:$0xff]  ;;  %v3599_v24 = vld [vmem:[%s4197_s4 + $0x700] sm:$0xff] }
 0x106   :  { %4386 = vst [vmem:[#allocation186_spill] sm:$0xff] %v3583_v32  ;;  %675 = vst [vmem:[#allocation2 + $0x80] sm:$0xff] %v286_v25  ;;  %v291_v25 = vpop.f32.mrb[6].mxu0  ;;  %v3604_v39 = vld [vmem:[%s4197_s4 + $0x708] sm:$0xff] }
 0x107   :  { %4387 = vst [vmem:[#allocation187_spill] sm:$0xff] %v3589_v51  ;;  %4388 = vst [vmem:[#allocation188_spill] sm:$0xff] %v3594_v23  ;;  %v3609_v51 = vld [vmem:[%s4197_s4 + $0x710] sm:$0xff]  ;;  %v3614_v23 = vld [vmem:[%s4197_s4 + $0x718] sm:$0xff]  ;;  %v293_v32 = vpop.f32.mrb[7].mxu0 }
 0x108   :  { %4389 = vst [vmem:[#allocation189_spill] sm:$0xff] %v3599_v24  ;;  %677 = vst [vmem:[#allocation2 + $0x90] sm:$0xff] %v399_v42  ;;  %v292_v42 = vadd.f32 %v291_v25, %v3353_v15  ;;  %v3620_v24 = vld [vmem:[%s4197_s4 + $0x720] sm:$0xff]  ;;  %v294_v25 = vadd.f32 %v293_v32, %v3374_v16  ;;  %v3653_v32 = vld [vmem:[%s4197_s4 + $0x750] sm:$0xff] }
 0x109   :  { %676 = vst [vmem:[#allocation2 + $0x88] sm:$0xff] %v288_v34  ;;  %4390 = vst [vmem:[#allocation190_spill] sm:$0xff] %v3604_v39  ;;  %v404_v34 = vpop.f32.mrb[6].mxu1  ;;  %v3625_v39 = vld [vmem:[%s4197_s4 + $0x728] sm:$0xff] }
 0x10a   :  { %4391 = vst [vmem:[#allocation191_spill] sm:$0xff] %v3609_v51  ;;  %4392 = vst [vmem:[#allocation192_spill] sm:$0xff] %v3614_v23  ;;  %v3630_v51 = vld [vmem:[%s4197_s4 + $0x730] sm:$0xff]  ;;  %v406_v23 = vpop.f32.mrb[7].mxu1 }
 0x10b   :  { %678 = vst [vmem:[#allocation2 + $0x98] sm:$0xff] %v401_v40  ;;  %4393 = vst [vmem:[#allocation193_spill] sm:$0xff] %v3620_v24  ;;  %v405_v40 = vadd.f32 %v404_v34, %v3371_v17  ;;  %v3642_v24 = vld [vmem:[%s4197_s4 + $0x740] sm:$0xff]  ;;  %v407_v34 = vadd.f32 %v406_v23, %v3392_v49  ;;  %v3668_v23 = vld [vmem:[%s4197_s4 + $0x768] sm:$0xff] }
 0x10c   :  { %4394 = vst [vmem:[#allocation194_spill] sm:$0xff] %v3625_v39  ;;  %4395 = vst [vmem:[#allocation195_spill] sm:$0xff] %v3630_v51  ;;  %v3647_v39 = vld [vmem:[%s4197_s4 + $0x748] sm:$0xff]  ;;  %v3658_v51 = vld [vmem:[%s4197_s4 + $0x758] sm:$0xff] }
 0x10d   :  { %4397 = vst [vmem:[#allocation197_spill] sm:$0xff] %v3642_v24  ;;  %4398 = vst [vmem:[#allocation198_spill] sm:$0xff] %v3647_v39  ;;  %v3678_v24 = vld [vmem:[%s4197_s4 + $0x778] sm:$0xff] }
 0x10e   :  { %683 = vst [vmem:[#allocation2 + $0xc0] sm:$0xff] %v292_v42  ;;  %4399 = vst [vmem:[#allocation199_spill] sm:$0xff] %v3653_v32  ;;  %v297_v42 = vpop.f32.mrb[8].mxu0  ;;  %v3673_v32 = vld [vmem:[%s4197_s4 + $0x770] sm:$0xff]  ;;  %v3701_v39 = vld [vmem:[%s4197_s4 + $0x798] sm:$0xff] }
 0x10f   :  { %4400 = vst [vmem:[#allocation200_spill] sm:$0xff] %v3658_v51  ;;  %685 = vst [vmem:[#allocation2 + $0xd0] sm:$0xff] %v405_v40  ;;  %v298_v40 = vadd.f32 %v297_v42, %v3353_v15  ;;  %v299_v2 = vpop.f32.mrb[9].mxu0  ;;  %v3684_v51 = vld [vmem:[%s4197_s4 + $0x780] sm:$0xff] }
 0x110   :  { %684 = vst [vmem:[#allocation2 + $0xc8] sm:$0xff] %v294_v25  ;;  %4402 = vst [vmem:[#allocation202_spill] sm:$0xff] %v3668_v23  ;;  %v410_v25 = vpop.f32.mrb[8].mxu1  ;;  %v3689_v23 = vld [vmem:[%s4197_s4 + $0x788] sm:$0xff]  ;;  %v300_v42 = vadd.f32 %v299_v2, %v3374_v16  ;;  %v3717_v2 = vld [vmem:[%s4197_s4 + $0x7b0] sm:$0xff] }
 0x111   :  { %4403 = vst [vmem:[#allocation203_spill] sm:$0xff] %v3673_v32  ;;  %4404 = vst [vmem:[#allocation204_spill] sm:$0xff] %v3678_v24  ;;  %v3694_v32 = vld [vmem:[%s4197_s4 + $0x790] sm:$0xff]  ;;  %v412_v24 = vpop.f32.mrb[9].mxu1 }
 0x112   :  { %686 = vst [vmem:[#allocation2 + $0xd8] sm:$0xff] %v407_v34  ;;  %4405 = vst [vmem:[#allocation205_spill] sm:$0xff] %v3684_v51  ;;  %v411_v34 = vadd.f32 %v410_v25, %v3371_v17  ;;  %v3706_v51 = vld [vmem:[%s4197_s4 + $0x7a0] sm:$0xff]  ;;  %v413_v25 = vadd.f32 %v412_v24, %v3392_v49  ;;  %v3732_v24 = vld [vmem:[%s4197_s4 + $0x7c8] sm:$0xff] }
 0x113   :  { %4406 = vst [vmem:[#allocation206_spill] sm:$0xff] %v3689_v23  ;;  %4407 = vst [vmem:[#allocation207_spill] sm:$0xff] %v3694_v32  ;;  %v3711_v23 = vld [vmem:[%s4197_s4 + $0x7a8] sm:$0xff]  ;;  %v3722_v32 = vld [vmem:[%s4197_s4 + $0x7b8] sm:$0xff] }
 0x114   :  { %4408 = vst [vmem:[#allocation208_spill] sm:$0xff] %v3701_v39  ;;  %4409 = vst [vmem:[#allocation209_spill] sm:$0xff] %v3706_v51  ;;  %v3727_v51 = vld [vmem:[%s4197_s4 + $0x7c0] sm:$0xff]  ;;  %v3753_v39 = vld [vmem:[%s4197_s4 + $0x7e8] sm:$0xff] }
 0x115   :  { %4410 = vst [vmem:[#allocation210_spill] sm:$0xff] %v3711_v23  ;;  %691 = vst [vmem:[#allocation2 + $0x100] sm:$0xff] %v298_v40  ;;  %v303_v40 = vpop.f32.mrb[10].mxu0 }
 0x116   :  { %4411 = vst [vmem:[#allocation211_spill] sm:$0xff] %v3717_v2  ;;  %4412 = vst [vmem:[#allocation212_spill] sm:$0xff] %v3722_v32  ;;  %v3737_v2 = vld [vmem:[%s4197_s4 + $0x7d0] sm:$0xff]  ;;  %v3742_v32 = vld [vmem:[%s4197_s4 + $0x7d8] sm:$0xff]  ;;  %v305_v23 = vpop.f32.mrb[11].mxu0 }
 0x117   :  { %4413 = vst [vmem:[#allocation213_spill] sm:$0xff] %v3727_v51  ;;  %693 = vst [vmem:[#allocation2 + $0x110] sm:$0xff] %v411_v34  ;;  %v304_v34 = vadd.f32 %v303_v40, %v3353_v15  ;;  %v3748_v51 = vld [vmem:[%s4197_s4 + $0x7e0] sm:$0xff]  ;;  %v306_v40 = vadd.f32 %v305_v23, %v3374_v16 }
 0x118   :  { %692 = vst [vmem:[#allocation2 + $0x108] sm:$0xff] %v300_v42  ;;  %4414 = vst [vmem:[#allocation214_spill] sm:$0xff] %v3732_v24  ;;  %v416_v42 = vpop.f32.mrb[10].mxu1  ;;  %v3765_v24 = vld [vmem:[%s4197_s4 + $0x7f8] sm:$0xff]  ;;  %v3781_v23 = vld [vmem:[%s4201_s6] sm:$0xff]  }
 0x119   :  { %4415 = vst [vmem:[#allocation215_spill] sm:$0xff] %v3737_v2  ;;  %4416 = vst [vmem:[#allocation216_spill] sm:$0xff] %v3742_v32  ;;  %v3758_v2 = vld [vmem:[%s4197_s4 + $0x7f0] sm:$0xff]  ;;  %v418_v32 = vpop.f32.mrb[11].mxu1 }
 0x11a   :  { %694 = vst [vmem:[#allocation2 + $0x118] sm:$0xff] %v413_v25  ;;  %4417 = vst [vmem:[#allocation217_spill] sm:$0xff] %v3748_v51  ;;  %v417_v25 = vadd.f32 %v416_v42, %v3371_v17  ;;  %v3770_v51 = vld [vmem:[%s4199_s0] sm:$0xff]  ;;  %v419_v42 = vadd.f32 %v418_v32, %v3392_v49 }
 0x11b   :  { %4418 = vst [vmem:[#allocation218_spill] sm:$0xff] %v3753_v39  ;;  %4419 = vst [vmem:[#allocation219_spill] sm:$0xff] %v3758_v2  ;;  %v3775_v39 = vld [vmem:[%s4200_s5] sm:$0xff]   ;;  %v3786_v2 = vld [vmem:[%s4200_s5 + $0x8] sm:$0xff]   ;;  %s3861_s5 = smov 0  }
 0x11c   :  { %4420 = vst [vmem:[#allocation220_spill] sm:$0xff] %v3765_v24  ;;  %4421 = vst [vmem:[#allocation221_spill] sm:$0xff] %v3770_v51  ;;  %v3791_v24 = vld [vmem:[%s4201_s6 + $0x8] sm:$0xff]   ;;  %v422_v51 = vpop.f32.mrb[12].mxu1 }
 0x11d   :  { %699 = vst [vmem:[#allocation2 + $0x140] sm:$0xff] %v304_v34  ;;  %701 = vst [vmem:[#allocation2 + $0x150] sm:$0xff] %v417_v25  ;;  %v309_v34 = vpop.f32.mrb[12].mxu0  ;;  %v423_v57 = vadd.f32 %v422_v51, %v3371_v17  ;;  %v424_v41 = vpop.f32.mrb[13].mxu1 }
 0x11e   :  { %700 = vst [vmem:[#allocation2 + $0x148] sm:$0xff] %v306_v40  ;;  %702 = vst [vmem:[#allocation2 + $0x158] sm:$0xff] %v419_v42  ;;  %v310_v32 = vadd.f32 %v309_v34, %v3353_v15  ;;  %v311_v31 = vpop.f32.mrb[13].mxu0  ;;  %v425_v25 = vadd.f32 %v424_v41, %v3392_v49  ;;  %v197_v40 = vsub.s32 7, %v3221_v18  ;;  %v428_v1 = vpop.f32.mrb[14].mxu1  ;;  %v3808_v41 = vrot.slane %v3271_v26, %v193_v56 }
 0x11f   :  { %v312_v60 = vadd.f32 %v311_v31, %v3374_v16  ;;  %709 = vst [vmem:[#allocation2 + $0x190] sm:$0xff] %v423_v57  ;;  %v315_v42 = vpop.f32.mrb[14].mxu0  ;;  %v3803_v31 = vrot.slane %v3271_v26, %v185_v33  ;;  %v429_v48 = vadd.f32 %v428_v1, %v3371_v17  ;;  %v3811_v18 = vrot.slane %v3271_v26, %v189_v5 }
 0x120   :  { %707 = vst [vmem:[#allocation2 + $0x180] sm:$0xff] %v310_v32  ;;  %710 = vst [vmem:[#allocation2 + $0x198] sm:$0xff] %v425_v25  ;;  %v316_v34 = vadd.f32 %v315_v42, %v3353_v15  ;;  %v317_v51 = vpop.f32.mrb[15].mxu0  ;;  %v430_v32 = vpop.f32.mrb[15].mxu1  ;;  %v3815_v15 = vrot.slane %v3271_v26, %v197_v40 }
 0x121   :  { %708 = vst [vmem:[#allocation2 + $0x188] sm:$0xff] %v312_v60  ;;  %v318_v50 = vadd.f32 %v317_v51, %v3374_v16  ;;  %v431_v57 = vadd.f32 %v430_v32, %v3392_v49  ;;  %717 = vst [vmem:[#allocation2 + $0x1d0] sm:$0xff] %v429_v48  ;;  %v499_v33 = vpop.f32.mrb[16].mxu0  ;;  %v612_v60 = vpop.f32.mrb[16].mxu1 }
 0x122   :  { %715 = vst [vmem:[#allocation2 + $0x1c0] sm:$0xff] %v316_v34  ;;  %v500_v17 = vadd.f32 %v499_v33, %v3803_v31  ;;  %v501_v1 = vpop.f32.mrb[17].mxu0  ;;  %v613_v56 = vadd.f32 %v612_v60, %v3808_v41  ;;  %v614_v5 = vpop.f32.mrb[17].mxu1 }
 0x123   :  { %716 = vst [vmem:[#allocation2 + $0x1c8] sm:$0xff] %v318_v50  ;;  %718 = vst [vmem:[#allocation2 + $0x1d8] sm:$0xff] %v431_v57  ;;  %v502_v16 = vadd.f32 %v501_v1, %v3811_v18  ;;  %v615_v25 = vadd.f32 %v614_v5, %v3815_v15  ;;  %v505_v26 = vpop.f32.mrb[18].mxu0  ;;  %v618_v50 = vpop.f32.mrb[18].mxu1 }
 0x124   :  { %663 = vst [vmem:[#allocation2 + $0x20] sm:$0xff] %v500_v17  ;;  %665 = vst [vmem:[#allocation2 + $0x30] sm:$0xff] %v613_v56  ;;  %v506_v48 = vadd.f32 %v505_v26, %v3803_v31  ;;  %v507_v49 = vpop.f32.mrb[19].mxu0  ;;  %v619_v40 = vadd.f32 %v618_v50, %v3808_v41  ;;  %v620_v34 = vpop.f32.mrb[19].mxu1 }
 0x125   :  { %664 = vst [vmem:[#allocation2 + $0x28] sm:$0xff] %v502_v16  ;;  %666 = vst [vmem:[#allocation2 + $0x38] sm:$0xff] %v615_v25  ;;  %v508_v42 = vadd.f32 %v507_v49, %v3811_v18  ;;  %v621_v51 = vadd.f32 %v620_v34, %v3815_v15  ;;  %v511_v32 = vpop.f32.mrb[20].mxu0  ;;  %v624_v33 = vpop.f32.mrb[20].mxu1 }
 0x126   :  { %671 = vst [vmem:[#allocation2 + $0x60] sm:$0xff] %v506_v48  ;;  %673 = vst [vmem:[#allocation2 + $0x70] sm:$0xff] %v619_v40  ;;  %v512_v57 = vadd.f32 %v511_v32, %v3803_v31  ;;  %v513_v17 = vpop.f32.mrb[21].mxu0  ;;  %v625_v60 = vadd.f32 %v624_v33, %v3808_v41  ;;  %v626_v56 = vpop.f32.mrb[21].mxu1 }
 0x127   :  { %672 = vst [vmem:[#allocation2 + $0x68] sm:$0xff] %v508_v42  ;;  %674 = vst [vmem:[#allocation2 + $0x78] sm:$0xff] %v621_v51  ;;  %v514_v1 = vadd.f32 %v513_v17, %v3811_v18  ;;  %v627_v16 = vadd.f32 %v626_v56, %v3815_v15  ;;  %v517_v5 = vpop.f32.mrb[22].mxu0  ;;  %v630_v26 = vpop.f32.mrb[22].mxu1 }
 0x128   :  { %679 = vst [vmem:[#allocation2 + $0xa0] sm:$0xff] %v512_v57  ;;  %681 = vst [vmem:[#allocation2 + $0xb0] sm:$0xff] %v625_v60  ;;  %v518_v25 = vadd.f32 %v517_v5, %v3803_v31  ;;  %v519_v48 = vpop.f32.mrb[23].mxu0  ;;  %v631_v50 = vadd.f32 %v630_v26, %v3808_v41  ;;  %v632_v40 = vpop.f32.mrb[23].mxu1 }
 0x129   :  { %680 = vst [vmem:[#allocation2 + $0xa8] sm:$0xff] %v514_v1  ;;  %682 = vst [vmem:[#allocation2 + $0xb8] sm:$0xff] %v627_v16  ;;  %v520_v49 = vadd.f32 %v519_v48, %v3811_v18  ;;  %v633_v42 = vadd.f32 %v632_v40, %v3815_v15  ;;  %v523_v34 = vpop.f32.mrb[24].mxu0  ;;  %v636_v32 = vpop.f32.mrb[24].mxu1 }
 0x12a   :  { %687 = vst [vmem:[#allocation2 + $0xe0] sm:$0xff] %v518_v25  ;;  %689 = vst [vmem:[#allocation2 + $0xf0] sm:$0xff] %v631_v50  ;;  %v524_v51 = vadd.f32 %v523_v34, %v3803_v31  ;;  %v525_v57 = vpop.f32.mrb[25].mxu0  ;;  %v637_v33 = vadd.f32 %v636_v32, %v3808_v41  ;;  %v638_v60 = vpop.f32.mrb[25].mxu1 }
 0x12b   :  { %688 = vst [vmem:[#allocation2 + $0xe8] sm:$0xff] %v520_v49  ;;  %690 = vst [vmem:[#allocation2 + $0xf8] sm:$0xff] %v633_v42  ;;  %v526_v17 = vadd.f32 %v525_v57, %v3811_v18  ;;  %v639_v1 = vadd.f32 %v638_v60, %v3815_v15 }
 0x12c   :  { %695 = vst [vmem:[#allocation2 + $0x120] sm:$0xff] %v524_v51  ;;  %697 = vst [vmem:[#allocation2 + $0x130] sm:$0xff] %v637_v33  ;;  %v529_v56 = vpop.f32.mrb[26].mxu0 }
 0x12d   :  { %696 = vst [vmem:[#allocation2 + $0x128] sm:$0xff] %v526_v17  ;;  %698 = vst [vmem:[#allocation2 + $0x138] sm:$0xff] %v639_v1  ;;  %v530_v16 = vadd.f32 %v529_v56, %v3803_v31  ;;  %v642_v5 = vpop.f32.mrb[26].mxu1  ;;  %v531_v25 = vpop.f32.mrb[27].mxu0 }
 0x12e   :  { %v643_v26 = vadd.f32 %v642_v5, %v3808_v41  ;;  %v532_v48 = vadd.f32 %v531_v25, %v3811_v18  ;;  %v644_v50 = vpop.f32.mrb[27].mxu1 }
 0x12f   :  { %703 = vst [vmem:[#allocation2 + $0x160] sm:$0xff] %v530_v16  ;;  %v645_v49 = vadd.f32 %v644_v50, %v3815_v15 }
 0x130   :  { %705 = vst [vmem:[#allocation2 + $0x170] sm:$0xff] %v643_v26  ;;  %704 = vst [vmem:[#allocation2 + $0x168] sm:$0xff] %v532_v48  ;;  %v535_v40 = vpop.f32.mrb[28].mxu0 }
 0x131   :  { %706 = vst [vmem:[#allocation2 + $0x178] sm:$0xff] %v645_v49  ;;  %v536_v42 = vadd.f32 %v535_v40, %v3803_v31  ;;  %v648_v34 = vpop.f32.mrb[28].mxu1  ;;  %v537_v51 = vpop.f32.mrb[29].mxu0 }
 0x132   :  { %v649_v32 = vadd.f32 %v648_v34, %v3808_v41  ;;  %v538_v57 = vadd.f32 %v537_v51, %v3811_v18  ;;  %v650_v33 = vpop.f32.mrb[29].mxu1 }
 0x133   :  { %711 = vst [vmem:[#allocation2 + $0x1a0] sm:$0xff] %v536_v42  ;;  %v651_v17 = vadd.f32 %v650_v33, %v3815_v15 }
 0x134   :  { %713 = vst [vmem:[#allocation2 + $0x1b0] sm:$0xff] %v649_v32  ;;  %712 = vst [vmem:[#allocation2 + $0x1a8] sm:$0xff] %v538_v57  ;;  %v541_v60 = vpop.f32.mrb[30].mxu0 }
 0x135   :  { %714 = vst [vmem:[#allocation2 + $0x1b8] sm:$0xff] %v651_v17  ;;  %v542_v1 = vadd.f32 %v541_v60, %v3803_v31  ;;  %v654_v56 = vpop.f32.mrb[30].mxu1  ;;  %v543_v16 = vpop.f32.mrb[31].mxu0 }
 0x136   :  { %v655_v5 = vadd.f32 %v654_v56, %v3808_v41  ;;  %v544_v25 = vadd.f32 %v543_v16, %v3811_v18  ;;  %v656_v26 = vpop.f32.mrb[31].mxu1 }
 0x137   :  { %719 = vst [vmem:[#allocation2 + $0x1e0] sm:$0xff] %v542_v1  ;;  %v657_v48 = vadd.f32 %v656_v26, %v3815_v15 }
 0x138   :  { %721 = vst [vmem:[#allocation2 + $0x1f0] sm:$0xff] %v655_v5  ;;  %720 = vst [vmem:[#allocation2 + $0x1e8] sm:$0xff] %v544_v25 }
 0x139   :  { %722 = vst [vmem:[#allocation2 + $0x1f8] sm:$0xff] %v657_v48 }
 0x13a LB: > { %v1554_v31 = vpack.c.bf16 %v2489_v20, %v2449_v59  ;;  %v1556_v41 = vpack.c.bf16 %v2484_v19, %v2444_v46  ;;  %v1558_v18 = vpack.c.bf16 %v2569_v36, %v2529_v28  ;;  %v1618_v15 = vpack.c.bf16 %v2499_v22, %v2459_v3  ;;  %1065 = vmatprep.mubr.f32.mxu0 %v1899_v2  ;;  %v4422_v25 = vld [vmem:[#allocation46_spill] sm:$0xff]  ;;  %s3949_s6 = ssub.s32 7, %s1911_s5  ;;  %s1422_s14 = sshll.u32 %s1911_s5, 6  ;;  %s1911_s5 = sphi %s3861_s5, %s991_s5   ;;  %v1907_v39 = vphi %v3775_v39, %v4645_v39   ;;  %v1903_v23 = vphi %v3781_v23, %v4644_v23   ;;  %v1899_v2 = vphi %v3786_v2, %v4643_v2   ;;  %v1895_v24 = vphi %v3791_v24, %v4642_v24  }
 0x13b   : > { %v1620_v50 = vpack.c.bf16 %v2494_v21, %v2454_v9  ;;  %v1622_v49 = vpack.c.bf16 %v2579_v38, %v2539_v30  ;;  %v1560_v40 = vpack.c.bf16 %v2564_v35, %v2524_v27  ;;  %v1562_v42 = vpack.c.bf16 %v2649_v53, %v2609_v44  ;;  %1136 = vmatprep.mubr.f32.mxu1 %v1899_v2  ;;  %v4423_v26 = vld [vmem:[#allocation54_spill] sm:$0xff]  ;;  %s1287_s15 = scalar_lea.vmem [#allocation2], %s1422_s14  ;;  %s1424_s16 = sshll.u32 %s1911_s5, 4 }
 0x13c   : > { %1555 = vmatprep.subr.bf16.mxu0 %v1554_v31  ;;  %1619 = vmatprep.subr.bf16.mxu1 %v1618_v15  ;;  %v1624_v34 = vpack.c.bf16 %v2574_v37, %v2534_v29  ;;  %v1626_v51 = vpack.c.bf16 %v2659_v55, %v2619_v47  ;;  %v1564_v32 = vpack.c.bf16 %v2644_v52, %v2604_v43  ;;  %v4424_v31 = vld [vmem:[#allocation35_spill] sm:$0xff]  ;;  %v4426_v15 = vld [vmem:[#allocation48_spill] sm:$0xff]  ;;  %s1351_s19 = scalar_lea.vmem %s4193_s7, %s1424_s16  ;;  %s1423_s20 = sshll.u32 %s3949_s6, 6 }
 0x13d   : > { %1557 = vmatpush1.bf16.msra.mxu0 %v1556_v41  ;;  %1621 = vmatpush1.bf16.msra.mxu1 %v1620_v50  ;;  %v1566_v57 = vpack.c.bf16 %v2729_v7, %v2689_v62  ;;  %v1628_v33 = vpack.c.bf16 %v2654_v54, %v2614_v45  ;;  %v1630_v17 = vpack.c.bf16 %v2739_v10, %v2699_v0  ;;  %v4425_v41 = vld [vmem:[#allocation40_spill] sm:$0xff]  ;;  %s1298_s21 = scalar_lea.vmem [#allocation2], %s1423_s20  ;;  %s1425_s22 = sshll.u32 %s3949_s6, 4 }
 0x13e   : > { %1559 = vmatprep.subr.bf16.mxu0 %v1558_v18  ;;  %1623 = vmatprep.subr.bf16.mxu1 %v1622_v49  ;;  %v1568_v60 = vpack.c.bf16 %v2724_v6, %v2684_v61  ;;  %v1570_v1 = vpack.c.bf16 %v2809_v14, %v2769_v11  ;;  %v1632_v56 = vpack.c.bf16 %v2734_v8, %v2694_v63  ;;  %v4427_v50 = vld [vmem:[#allocation56_spill] sm:$0xff]  ;;  %s1361_s24 = scalar_lea.vmem %s4193_s7, %s1425_s22 }
 0x13f   : > { %v1634_v16 = vpack.c.bf16 %v2819_v58, %v2779_v13  ;;  %v1572_v5 = vpack.c.bf16 %v2804_v12, %v2764_v4  ;;  %v1574_v48 = vpack.c.bf16 %v4423_v26, %v4422_v25  ;;  %v1636_v18 = vpack.c.bf16 %v4425_v41, %v4424_v31  ;;  %v4436_v26 = vld [vmem:[#allocation61_spill] sm:$0xff]  ;;  %v4438_v41 = vld [vmem:[#allocation78_spill] sm:$0xff] }
 0x140   : > { %v1638_v49 = vpack.c.bf16 %v4427_v50, %v4426_v15  ;;  %v4437_v31 = vld [vmem:[#allocation69_spill] sm:$0xff]  ;;  %v4440_v15 = vld [vmem:[#allocation63_spill] sm:$0xff] }
 0x141   : > { %1561 = vmatpush1.bf16.msra.mxu0 %v1560_v40  ;;  %1625 = vmatpush1.bf16.msra.mxu1 %v1624_v34  ;;  %v1914_v40 = vmov 0   ;;  %v4429_v34 = vld [vmem:[#allocation53_spill] sm:$0xff]  ;;  %v4441_v50 = vld [vmem:[#allocation71_spill] sm:$0xff] }
 0x142   : > { %1563 = vmatprep.subr.bf16.mxu0 %v1562_v42  ;;  %1627 = vmatprep.subr.bf16.mxu1 %v1626_v51  ;;  %v4428_v42 = vld [vmem:[#allocation45_spill] sm:$0xff] }
 0x143   : > { %1852 = vset.pattern.permute.xlu0 %v1914_v40  ;;  %v1576_v51 = vpack.c.bf16 %v4429_v34, %v4428_v42  ;;  %v1644_v42 = vpack.c.bf16 %v4441_v50, %v4440_v15  ;;  %v4442_v34 = vld [vmem:[#allocation80_spill] sm:$0xff]  ;;  %v997_v50 = vstv %s1911_s5  ;;  %s991_s5 = sadd.s32 1, %s1911_s5  }
 0x144   : > { %p988_p0 = scmp.ge.s32.totalorder %s991_s5, 8  }
 0x145   : > { %1565 = vmatpush1.bf16.msra.mxu0 %v1564_v32  ;;  %1629 = vmatpush1.bf16.msra.mxu1 %v1628_v33  ;;  %v4430_v32 = vld [vmem:[#allocation62_spill] sm:$0xff] }
 0x146   : > { %1567 = vmatprep.subr.bf16.mxu0 %v1566_v57  ;;  %1631 = vmatprep.subr.bf16.mxu1 %v1630_v17  ;;  %v4431_v57 = vld [vmem:[#allocation70_spill] sm:$0xff]  ;;  %v4432_v17 = vld [vmem:[#allocation47_spill] sm:$0xff] }
 0x147   : > { %v1578_v33 = vpack.c.bf16 %v4431_v57, %v4430_v32  ;;  %v4444_v57 = vld [vmem:[#allocation77_spill] sm:$0xff] }
 0x149   : > { %1569 = vmatpush1.bf16.msra.mxu0 %v1568_v60  ;;  %1633 = vmatpush1.bf16.msra.mxu1 %v1632_v56  ;;  %v4433_v60 = vld [vmem:[#allocation55_spill] sm:$0xff]  ;;  %v4434_v56 = vld [vmem:[#allocation64_spill] sm:$0xff] }
 0x14a   : > { %1571 = vmatprep.subr.bf16.mxu0 %v1570_v1  ;;  %1635 = vmatprep.subr.bf16.mxu1 %v1634_v16  ;;  %v1640_v1 = vpack.c.bf16 %v4433_v60, %v4432_v17  ;;  %v4435_v16 = vld [vmem:[#allocation72_spill] sm:$0xff]  ;;  %v4446_v60 = vld [vmem:[#allocation94_spill] sm:$0xff] }
 0x14b   : > { %v1642_v25 = vpack.c.bf16 %v4435_v16, %v4434_v56  ;;  %v4448_v56 = vld [vmem:[#allocation79_spill] sm:$0xff] }
 0x14c   : > { %v4449_v16 = vld [vmem:[#allocation87_spill] sm:$0xff] }
 0x14d   : > { %1573 = vmatpush1.bf16.msra.mxu0 %v1572_v5  ;;  %1637 = vmatpush1.bf16.msra.mxu1 %v1636_v18  ;;  %v1580_v5 = vpack.c.bf16 %v4437_v31, %v4436_v26  ;;  %v1648_v26 = vpack.c.bf16 %v4449_v16, %v4448_v56  ;;  %v4450_v31 = vld [vmem:[#allocation96_spill] sm:$0xff]  ;;  %v4460_v16 = vld [vmem:[#allocation221_spill] sm:$0xff] }
 0x14e   : > { %1575 = vmatprep.subr.bf16.mxu0 %v1574_v48  ;;  %1639 = vmatprep.subr.bf16.mxu1 %v1638_v49  ;;  %v4439_v48 = vld [vmem:[#allocation86_spill] sm:$0xff]  ;;  %v4443_v49 = vld [vmem:[#allocation88_spill] sm:$0xff]  ;;  %vm998_vm0 = vcmp.gt.s32.totalorder %v4460_v16, %v997_v50  ;;  %v4469_v50 = vld [vmem:[#allocation125_spill] sm:$0xff] }
 0x14f   : > { %v1582_v18 = vpack.c.bf16 %v4439_v48, %v4438_v41  ;;  %v1646_v32 = vpack.c.bf16 %v4443_v49, %v4442_v34  ;;  %v4451_v41 = vld [vmem:[#allocation104_spill] sm:$0xff]  ;;  %v4456_v49 = vld [vmem:[#allocation95_spill] sm:$0xff] }
 0x150   : > { %v1650_v48 = vpack.c.bf16 %v4451_v41, %v4450_v31  ;;  %v4462_v31 = vld [vmem:[#allocation117_spill] sm:$0xff] }
 0x151   : > { %1577 = vmatpush1.bf16.msra.mxu0 %v1576_v51  ;;  %1641 = vmatpush1.bf16.msra.mxu1 %v1640_v1  ;;  %v4445_v51 = vld [vmem:[#allocation85_spill] sm:$0xff] }
 0x152   : > { %1579 = vmatprep.subr.bf16.mxu0 %v1578_v33  ;;  %1643 = vmatprep.subr.bf16.mxu1 %v1642_v25  ;;  %v1584_v17 = vpack.c.bf16 %v4445_v51, %v4444_v57  ;;  %v4447_v33 = vld [vmem:[#allocation102_spill] sm:$0xff]  ;;  %v4452_v25 = vld [vmem:[#allocation93_spill] sm:$0xff]  ;;  %v4457_v57 = vld [vmem:[#allocation103_spill] sm:$0xff] }
 0x153   : > { %v1586_v1 = vpack.c.bf16 %v4447_v33, %v4446_v60  ;;  %v1652_v51 = vpack.c.bf16 %v4457_v57, %v4456_v49  ;;  %v4458_v60 = vld [vmem:[#allocation112_spill] sm:$0xff] }
 0x154   : > { %v4459_v33 = vld [vmem:[#allocation120_spill] sm:$0xff] }
 0x155   : > { %1581 = vmatpush1.bf16.msra.mxu0 %v1580_v5  ;;  %1645 = vmatpush1.bf16.msra.mxu1 %v1644_v42  ;;  %v4453_v5 = vld [vmem:[#allocation101_spill] sm:$0xff]  ;;  %v4455_v42 = vld [vmem:[#allocation118_spill] sm:$0xff]  ;;  %v1654_v56 = vpack.c.bf16 %v4459_v33, %v4458_v60  ;;  %v4467_v49 = vld [vmem:[#allocation128_spill] sm:$0xff] }
 0x156   : > { %1583 = vmatprep.subr.bf16.mxu0 %v1582_v18  ;;  %1647 = vmatprep.subr.bf16.mxu1 %v1646_v32  ;;  %v1588_v15 = vpack.c.bf16 %v4453_v5, %v4452_v25  ;;  %v4454_v18 = vld [vmem:[#allocation110_spill] sm:$0xff]  ;;  %v999_v32 = vstv %s3949_s6  ;;  %v1343_v25 = vsel %vm998_vm0, 1, %v1914_v40  ;;  %v4468_v57 = vld [vmem:[#allocation136_spill] sm:$0xff]  ;;  %v4470_v33 = vld [vmem:[#allocation133_spill] sm:$0xff] }
 0x157   : > { %v1590_v34 = vpack.c.bf16 %v4455_v42, %v4454_v18  ;;  %vm1000_vm1 = vcmp.gt.s32.totalorder %v4460_v16, %v999_v32  ;;  %v4465_v18 = vld [vmem:[#allocation111_spill] sm:$0xff]  ;;  %v1658_v60 = vpack.c.bf16 %v4468_v57, %v4467_v49  ;;  %1345 = vperm.xlu0 %1852, %v1343_v25   ;;  %v4477_v25 = vld [vmem:[#allocation141_spill] sm:$0xff]  ;;  %v4479_v49 = vld [vmem:[#allocation158_spill] sm:$0xff] }
 0x158   : > { %v4466_v42 = vld [vmem:[#allocation119_spill] sm:$0xff] }
 0x159   : > { %1585 = vmatpush1.bf16.msra.mxu0 %v1584_v17  ;;  %1649 = vmatpush1.bf16.msra.mxu1 %v1648_v26  ;;  %v4461_v17 = vld [vmem:[#allocation109_spill] sm:$0xff]  ;;  %v4464_v26 = vld [vmem:[#allocation134_spill] sm:$0xff]  ;;  %v4481_v57 = vld [vmem:[#allocation143_spill] sm:$0xff] }
 0x15a   : > { %1587 = vmatprep.subr.bf16.mxu0 %v1586_v1  ;;  %1651 = vmatprep.subr.bf16.mxu1 %v1650_v48  ;;  %v1592_v41 = vpack.c.bf16 %v4462_v31, %v4461_v17  ;;  %v4463_v1 = vld [vmem:[#allocation126_spill] sm:$0xff]  ;;  %v1656_v48 = vpack.c.bf16 %v4466_v42, %v4465_v18  ;;  %v1596_v17 = vpack.c.bf16 %v4470_v33, %v4469_v50  ;;  %v4473_v31 = vld [vmem:[#allocation127_spill] sm:$0xff]  ;;  %v4475_v18 = vld [vmem:[#allocation144_spill] sm:$0xff] }
 0x15b   : > { %v1594_v5 = vpack.c.bf16 %v4464_v26, %v4463_v1  ;;  %v4474_v1 = vld [vmem:[#allocation135_spill] sm:$0xff] }
 0x15c   : > { %v1660_v26 = vpack.c.bf16 %v4474_v1, %v4473_v31  ;;  %v4482_v50 = vld [vmem:[#allocation151_spill] sm:$0xff]  ;;  %v4485_v31 = vld [vmem:[#allocation157_spill] sm:$0xff] }
 0x15d   : > { %1589 = vmatpush1.bf16.msra.mxu0 %v1588_v15  ;;  %1653 = vmatpush1.bf16.msra.mxu1 %v1652_v51  ;;  %v1353_v15 = vsel %vm1000_vm1, 1, %v1914_v40  ;;  %v4472_v51 = vld [vmem:[#allocation150_spill] sm:$0xff]  ;;  %v4478_v40 = vld [vmem:[#allocation149_spill] sm:$0xff]  ;;  %v1664_v33 = vpack.c.bf16 %v4482_v50, %v4481_v57 }
 0x15e   : > { %1591 = vmatprep.subr.bf16.mxu0 %v1590_v34  ;;  %1655 = vmatprep.subr.bf16.mxu1 %v1654_v56  ;;  %v4471_v34 = vld [vmem:[#allocation142_spill] sm:$0xff]  ;;  %v4476_v56 = vld [vmem:[#allocation152_spill] sm:$0xff]  ;;  %v4486_v1 = vld [vmem:[#allocation165_spill] sm:$0xff] }
 0x15f   : > { %v1598_v32 = vpack.c.bf16 %v4472_v51, %v4471_v34  ;;  %v1662_v42 = vpack.c.bf16 %v4476_v56, %v4475_v18  ;;  %1355 = vperm.xlu0 %1852, %v1353_v15   ;;  %v4483_v34 = vld [vmem:[#allocation160_spill] sm:$0xff]  ;;  %v1604_v15 = vpack.c.bf16 %v4486_v1, %v4485_v31  ;;  %v4488_v18 = vld [vmem:[#allocation182_spill] sm:$0xff]  ;;  %v4490_v56 = vld [vmem:[#allocation167_spill] sm:$0xff] }
 0x160   : > { %v4484_v51 = vld [vmem:[#allocation168_spill] sm:$0xff]  ;;  %v4494_v57 = vld [vmem:[#allocation181_spill] sm:$0xff] }
 0x161   : > { %1593 = vmatpush1.bf16.msra.mxu0 %v1592_v41  ;;  %1657 = vmatpush1.bf16.msra.mxu1 %v1656_v48  ;;  %v1600_v41 = vpack.c.bf16 %v4478_v40, %v4477_v25  ;;  %v4491_v40 = vld [vmem:[#allocation176_spill] sm:$0xff] }
 0x162   : > { %1595 = vmatprep.subr.bf16.mxu0 %v1594_v5  ;;  %1659 = vmatprep.subr.bf16.mxu1 %v1658_v60  ;;  %v4480_v5 = vld [vmem:[#allocation166_spill] sm:$0xff]  ;;  %v1666_v60 = vpack.c.bf16 %v4484_v51, %v4483_v34  ;;  %v4498_v51 = vld [vmem:[#allocation183_spill] sm:$0xff]  ;;  %v4499_v1 = vld [vmem:[#allocation192_spill] sm:$0xff] }
 0x163   : > { %v1602_v48 = vpack.c.bf16 %v4480_v5, %v4479_v49  ;;  %v4492_v49 = vld [vmem:[#allocation184_spill] sm:$0xff]  ;;  %v4496_v34 = vld [vmem:[#allocation198_spill] sm:$0xff] }
 0x164   : > { %v1670_v5 = vpack.c.bf16 %v4492_v49, %v4491_v40  ;;  %v4504_v40 = vld [vmem:[#allocation214_spill] sm:$0xff]  ;;  %v4506_v49 = vld [vmem:[#allocation199_spill] sm:$0xff] }
 0x165   : > { %1597 = vmatpush1.bf16.msra.mxu0 %v1596_v17  ;;  %1661 = vmatpush1.bf16.msra.mxu1 %v1660_v26  ;;  %v4487_v17 = vld [vmem:[#allocation174_spill] sm:$0xff]  ;;  %v4489_v26 = vld [vmem:[#allocation159_spill] sm:$0xff] }
 0x166   : > { %1599 = vmatprep.subr.bf16.mxu0 %v1598_v32  ;;  %1663 = vmatprep.subr.bf16.mxu1 %v1662_v42  ;;  %v1606_v32 = vpack.c.bf16 %v4488_v18, %v4487_v17  ;;  %v1668_v25 = vpack.c.bf16 %v4490_v56, %v4489_v26  ;;  %v4493_v42 = vld [vmem:[#allocation173_spill] sm:$0xff]  ;;  %v4500_v17 = vld [vmem:[#allocation200_spill] sm:$0xff] }
 0x167   : > { %v1608_v50 = vpack.c.bf16 %v4494_v57, %v4493_v42  ;;  %v1674_v18 = vpack.c.bf16 %v4500_v17, %v4499_v1  ;;  %v4502_v26 = vld [vmem:[#allocation197_spill] sm:$0xff]  ;;  %v4507_v57 = vld [vmem:[#allocation208_spill] sm:$0xff]  ;;  %v4514_v17 = vld [vmem:[#allocation215_spill] sm:$0xff] }
 0x168   : > { %v4512_v1 = vld [vmem:[#allocation8_spill] sm:$0xff] }
 0x169   : > { %1601 = vmatpush1.bf16.msra.mxu0 %v1600_v41  ;;  %1665 = vmatpush1.bf16.msra.mxu1 %v1664_v33  ;;  %v4495_v41 = vld [vmem:[#allocation190_spill] sm:$0xff]  ;;  %v4497_v33 = vld [vmem:[#allocation175_spill] sm:$0xff] }
 0x16a   : > { %1603 = vmatprep.subr.bf16.mxu0 %v1602_v48  ;;  %1667 = vmatprep.subr.bf16.mxu1 %v1666_v60  ;;  %v1610_v48 = vpack.c.bf16 %v4496_v34, %v4495_v41  ;;  %v1672_v31 = vpack.c.bf16 %v4498_v51, %v4497_v33  ;;  %v4501_v60 = vld [vmem:[#allocation189_spill] sm:$0xff]  ;;  %v4508_v41 = vld [vmem:[#allocation216_spill] sm:$0xff] }
 0x16b   : > { %v1612_v56 = vpack.c.bf16 %v4502_v26, %v4501_v60  ;;  %v1678_v34 = vpack.c.bf16 %v4508_v41, %v4507_v57  ;;  %v4510_v33 = vld [vmem:[#allocation213_spill] sm:$0xff]  ;;  %v4515_v26 = vld [vmem:[#allocation6_spill] sm:$0xff]  ;;  %v4520_v57 = vld [vmem:[#allocation16_spill] sm:$0xff] }
 0x16c   : > { %v4522_v41 = vld [vmem:[#allocation9_spill] sm:$0xff] }
 0x16d   : > { %1605 = vmatpush1.bf16.msra.mxu0 %v1604_v15  ;;  %1669 = vmatpush1.bf16.msra.mxu1 %v1668_v25  ;;  %v4503_v15 = vld [vmem:[#allocation206_spill] sm:$0xff]  ;;  %v4505_v25 = vld [vmem:[#allocation191_spill] sm:$0xff] }
 0x16e   : > { %1607 = vmatprep.subr.bf16.mxu0 %v1606_v32  ;;  %1671 = vmatprep.subr.bf16.mxu1 %v1670_v5  ;;  %v1614_v32 = vpack.c.bf16 %v4504_v40, %v4503_v15  ;;  %v1676_v42 = vpack.c.bf16 %v4506_v49, %v4505_v25  ;;  %v4509_v5 = vld [vmem:[#allocation205_spill] sm:$0xff]  ;;  %v4516_v15 = vld [vmem:[#allocation10_spill] sm:$0xff]  ;;  %v4518_v25 = vld [vmem:[#allocation7_spill] sm:$0xff] }
 0x16f   : > { %v1616_v51 = vpack.c.bf16 %v4510_v33, %v4509_v5  ;;  %v1746_v40 = vpack.c.bf16 %v4516_v15, %v4515_v26  ;;  %v4523_v33 = vld [vmem:[#allocation14_spill] sm:$0xff]  ;;  %v4529_v26 = vld [vmem:[#allocation13_spill] sm:$0xff] }
 0x170   : > { %v4530_v15 = vld [vmem:[#allocation17_spill] sm:$0xff] }
 0x171   : > { %1609 = vmatpush1.bf16.msra.mxu0 %v1608_v50  ;;  %1673 = vmatpush1.bf16.msra.mxu1 %v1672_v31  ;;  %v4511_v50 = vld [vmem:[#allocation4_spill] sm:$0xff]  ;;  %v4513_v31 = vld [vmem:[#allocation207_spill] sm:$0xff] }
 0x172   : > { %1611 = vmatprep.subr.bf16.mxu0 %v1610_v48  ;;  %1675 = vmatprep.subr.bf16.mxu1 %v1674_v18  ;;  %v1682_v48 = vpack.c.bf16 %v4512_v1, %v4511_v50  ;;  %v1680_v60 = vpack.c.bf16 %v4514_v17, %v4513_v31  ;;  %v4517_v18 = vld [vmem:[#allocation3_spill] sm:$0xff]  ;;  %v4524_v50 = vld [vmem:[#allocation18_spill] sm:$0xff]  ;;  %v4528_v17 = vld [vmem:[#allocation24_spill] sm:$0xff] }
 0x173   : > { %v1684_v49 = vpack.c.bf16 %v4518_v25, %v4517_v18  ;;  %v1750_v1 = vpack.c.bf16 %v4524_v50, %v4523_v33  ;;  %v1752_v18 = vpack.c.bf16 %v4530_v15, %v4529_v26  ;;  %v4532_v25 = vld [vmem:[#allocation26_spill] sm:$0xff]  ;;  %v4537_v33 = vld [vmem:[#allocation21_spill] sm:$0xff]  ;;  %v4542_v26 = vld [vmem:[#allocation31_spill] sm:$0xff] }
 0x174   : > { %v4538_v50 = vld [vmem:[#allocation25_spill] sm:$0xff] }
 0x175   : > { %1613 = vmatpush1.bf16.msra.mxu0 %v1612_v56  ;;  %1677 = vmatpush1.bf16.msra.mxu1 %v1676_v42  ;;  %v4519_v56 = vld [vmem:[#allocation12_spill] sm:$0xff]  ;;  %v4521_v42 = vld [vmem:[#allocation5_spill] sm:$0xff] }
 0x176   : > { %1615 = vmatprep.subr.bf16.mxu0 %v1614_v32  ;;  %1679 = vmatprep.subr.bf16.mxu1 %v1678_v34  ;;  %v1686_v32 = vpack.c.bf16 %v4520_v57, %v4519_v56  ;;  %v1748_v5 = vpack.c.bf16 %v4522_v41, %v4521_v42  ;;  %v4525_v34 = vld [vmem:[#allocation11_spill] sm:$0xff]  ;;  %v4536_v41 = vld [vmem:[#allocation32_spill] sm:$0xff] }
 0x177   : > { %v4534_v57 = vld [vmem:[#allocation23_spill] sm:$0xff] }
 0x179   : > { %1617 = vmatpush1.bf16.msra.mxu0 %v1616_v51  ;;  %1681 = vmatpush1.bf16.msra.mxu1 %v1680_v60  ;;  %v4526_v51 = vld [vmem:[#allocation15_spill] sm:$0xff] }
 0x17a   : > { %1683 = vmatprep.subr.bf16.mxu0 %v1682_v48  ;;  %1747 = vmatprep.subr.bf16.mxu1 %v1746_v40  ;;  %v1688_v31 = vpack.c.bf16 %v4526_v51, %v4525_v34  ;;  %v4527_v48 = vld [vmem:[#allocation20_spill] sm:$0xff]  ;;  %v4531_v40 = vld [vmem:[#allocation22_spill] sm:$0xff]  ;;  %v1756_v34 = vpack.c.bf16 %v4538_v50, %v4537_v33  ;;  %v4550_v33 = vld [vmem:[#allocation41_spill] sm:$0xff] }
 0x17b   : > { %v1690_v60 = vpack.c.bf16 %v4528_v17, %v4527_v48  ;;  %v1754_v56 = vpack.c.bf16 %v4532_v25, %v4531_v40  ;;  %v4540_v51 = vld [vmem:[#allocation34_spill] sm:$0xff]  ;;  %v4541_v17 = vld [vmem:[#allocation27_spill] sm:$0xff]  ;;  %v4546_v25 = vld [vmem:[#allocation33_spill] sm:$0xff] }
 0x17c   : > { %1066 = vmatmul.mubr.f32.vlgmr.msra.gmra.mrb[0].mxu0 %v1907_v39  ;;  %1137 = vmatmul.mubr.f32.vlgmr.msra.gmra.mrb[0].mxu1 %v1907_v39  ;;  %v1696_v15 = vpack.c.bf16 %v4542_v26, %v4541_v17  ;;  %v4544_v40 = vld [vmem:[#allocation42_spill] sm:$0xff]  ;;  %v4555_v26 = vld [vmem:[#allocation52_spill] sm:$0xff] }
 0x17d   : > { %1685 = vmatpush1.bf16.msra.mxu0 %v1684_v49  ;;  %1749 = vmatpush1.bf16.msra.mxu1 %v1748_v5  ;;  %v4533_v49 = vld [vmem:[#allocation19_spill] sm:$0xff] }
 0x17e   : > { %1687 = vmatprep.subr.bf16.mxu0 %v1686_v32  ;;  %1751 = vmatprep.subr.bf16.mxu1 %v1750_v1  ;;  %v1692_v42 = vpack.c.bf16 %v4534_v57, %v4533_v49  ;;  %v4535_v32 = vld [vmem:[#allocation28_spill] sm:$0xff]  ;;  %v4539_v1 = vld [vmem:[#allocation30_spill] sm:$0xff]  ;;  %v4547_v57 = vld [vmem:[#allocation39_spill] sm:$0xff] }
 0x17f   : > { %1207 = vmatprep.mubr.f32.mxu0 %v1899_v2  ;;  %1278 = vmatprep.mubr.f32.mxu1 %v1899_v2  ;;  %v1694_v5 = vpack.c.bf16 %v4536_v41, %v4535_v32  ;;  %v1758_v48 = vpack.c.bf16 %v4540_v51, %v4539_v1  ;;  %v4548_v32 = vld [vmem:[#allocation44_spill] sm:$0xff]  ;;  %v4552_v1 = vld [vmem:[#allocation58_spill] sm:$0xff]  ;;  %v4554_v51 = vld [vmem:[#allocation43_spill] sm:$0xff] }
 0x180   : > { %v1762_v41 = vpack.c.bf16 %v4548_v32, %v4547_v57  ;;  %v4560_v57 = vld [vmem:[#allocation74_spill] sm:$0xff]  ;;  %v4562_v32 = vld [vmem:[#allocation59_spill] sm:$0xff] }
 0x181   : > { %1689 = vmatpush1.bf16.msra.mxu0 %v1688_v31  ;;  %1753 = vmatpush1.bf16.msra.mxu1 %v1752_v18  ;;  %v4543_v31 = vld [vmem:[#allocation37_spill] sm:$0xff] }
 0x182   : > { %1691 = vmatprep.subr.bf16.mxu0 %v1690_v60  ;;  %1755 = vmatprep.subr.bf16.mxu1 %v1754_v56  ;;  %v1698_v60 = vpack.c.bf16 %v4544_v40, %v4543_v31  ;;  %v4545_v18 = vld [vmem:[#allocation29_spill] sm:$0xff]  ;;  %v4549_v56 = vld [vmem:[#allocation36_spill] sm:$0xff] }
 0x183   : > { %v1760_v49 = vpack.c.bf16 %v4546_v25, %v4545_v18  ;;  %v1700_v50 = vpack.c.bf16 %v4550_v33, %v4549_v56  ;;  %v4556_v31 = vld [vmem:[#allocation60_spill] sm:$0xff]  ;;  %v4558_v18 = vld [vmem:[#allocation57_spill] sm:$0xff] }
 0x184   : > { %v1766_v40 = vpack.c.bf16 %v4556_v31, %v4555_v26  ;;  %v4563_v33 = vld [vmem:[#allocation68_spill] sm:$0xff]  ;;  %v4568_v26 = vld [vmem:[#allocation90_spill] sm:$0xff]  ;;  %v4570_v31 = vld [vmem:[#allocation75_spill] sm:$0xff] }
 0x185   : > { %1693 = vmatpush1.bf16.msra.mxu0 %v1692_v42  ;;  %1757 = vmatpush1.bf16.msra.mxu1 %v1756_v34  ;;  %v4551_v42 = vld [vmem:[#allocation50_spill] sm:$0xff] }
 0x186   : > { %1695 = vmatprep.subr.bf16.mxu0 %v1694_v5  ;;  %1759 = vmatprep.subr.bf16.mxu1 %v1758_v48  ;;  %v1702_v5 = vpack.c.bf16 %v4552_v1, %v4551_v42  ;;  %v4553_v34 = vld [vmem:[#allocation38_spill] sm:$0xff]  ;;  %v4557_v48 = vld [vmem:[#allocation49_spill] sm:$0xff]  ;;  %v4564_v42 = vld [vmem:[#allocation76_spill] sm:$0xff] }
 0x187   : > { %v1764_v17 = vpack.c.bf16 %v4554_v51, %v4553_v34  ;;  %v1704_v25 = vpack.c.bf16 %v4558_v18, %v4557_v48  ;;  %v1770_v1 = vpack.c.bf16 %v4564_v42, %v4563_v33  ;;  %v4566_v34 = vld [vmem:[#allocation73_spill] sm:$0xff]  ;;  %v4571_v18 = vld [vmem:[#allocation84_spill] sm:$0xff]  ;;  %v4576_v33 = vld [vmem:[#allocation106_spill] sm:$0xff] }
 0x188   : > { %v4578_v42 = vld [vmem:[#allocation91_spill] sm:$0xff] }
 0x189   : > { %1697 = vmatpush1.bf16.msra.mxu0 %v1696_v15  ;;  %1761 = vmatpush1.bf16.msra.mxu1 %v1760_v49  ;;  %v4559_v15 = vld [vmem:[#allocation66_spill] sm:$0xff]  ;;  %v4561_v49 = vld [vmem:[#allocation51_spill] sm:$0xff] }
 0x18a   : > { %1699 = vmatprep.subr.bf16.mxu0 %v1698_v60  ;;  %1763 = vmatprep.subr.bf16.mxu1 %v1762_v41  ;;  %v1706_v60 = vpack.c.bf16 %v4560_v57, %v4559_v15  ;;  %v1768_v56 = vpack.c.bf16 %v4562_v32, %v4561_v49  ;;  %v4565_v41 = vld [vmem:[#allocation65_spill] sm:$0xff]  ;;  %v4572_v15 = vld [vmem:[#allocation92_spill] sm:$0xff] }
 0x18b   : > { %v1708_v51 = vpack.c.bf16 %v4566_v34, %v4565_v41  ;;  %v1774_v57 = vpack.c.bf16 %v4572_v15, %v4571_v18  ;;  %v4574_v49 = vld [vmem:[#allocation89_spill] sm:$0xff]  ;;  %v4579_v34 = vld [vmem:[#allocation100_spill] sm:$0xff]  ;;  %v4584_v18 = vld [vmem:[#allocation122_spill] sm:$0xff] }
 0x18c   : > { %v4586_v15 = vld [vmem:[#allocation107_spill] sm:$0xff] }
 0x18d   : > { %1701 = vmatpush1.bf16.msra.mxu0 %v1700_v50  ;;  %1765 = vmatpush1.bf16.msra.mxu1 %v1764_v17  ;;  %v4567_v50 = vld [vmem:[#allocation82_spill] sm:$0xff]  ;;  %v4569_v17 = vld [vmem:[#allocation67_spill] sm:$0xff] }
 0x18e   : > { %1703 = vmatprep.subr.bf16.mxu0 %v1702_v5  ;;  %1767 = vmatprep.subr.bf16.mxu1 %v1766_v40  ;;  %v1710_v5 = vpack.c.bf16 %v4568_v26, %v4567_v50  ;;  %v1772_v48 = vpack.c.bf16 %v4570_v31, %v4569_v17  ;;  %v4573_v40 = vld [vmem:[#allocation81_spill] sm:$0xff]  ;;  %v4580_v50 = vld [vmem:[#allocation108_spill] sm:$0xff] }
 0x18f   : > { %v1712_v32 = vpack.c.bf16 %v4574_v49, %v4573_v40  ;;  %v1778_v26 = vpack.c.bf16 %v4580_v50, %v4579_v34  ;;  %v4582_v17 = vld [vmem:[#allocation105_spill] sm:$0xff]  ;;  %v4587_v49 = vld [vmem:[#allocation116_spill] sm:$0xff]  ;;  %v4592_v34 = vld [vmem:[#allocation138_spill] sm:$0xff] }
 0x190   : > { %v4594_v50 = vld [vmem:[#allocation123_spill] sm:$0xff] }
 0x191   : > { %1705 = vmatpush1.bf16.msra.mxu0 %v1704_v25  ;;  %1769 = vmatpush1.bf16.msra.mxu1 %v1768_v56  ;;  %v4575_v25 = vld [vmem:[#allocation98_spill] sm:$0xff]  ;;  %v4577_v56 = vld [vmem:[#allocation83_spill] sm:$0xff] }
 0x192   : > { %1707 = vmatprep.subr.bf16.mxu0 %v1706_v60  ;;  %1771 = vmatprep.subr.bf16.mxu1 %v1770_v1  ;;  %v1714_v60 = vpack.c.bf16 %v4576_v33, %v4575_v25  ;;  %v1776_v41 = vpack.c.bf16 %v4578_v42, %v4577_v56  ;;  %v4581_v1 = vld [vmem:[#allocation97_spill] sm:$0xff]  ;;  %v4588_v25 = vld [vmem:[#allocation124_spill] sm:$0xff] }
 0x193   : > { %v1716_v31 = vpack.c.bf16 %v4582_v17, %v4581_v1  ;;  %v1782_v33 = vpack.c.bf16 %v4588_v25, %v4587_v49  ;;  %v4590_v56 = vld [vmem:[#allocation121_spill] sm:$0xff]  ;;  %v4595_v17 = vld [vmem:[#allocation132_spill] sm:$0xff]  ;;  %v4600_v49 = vld [vmem:[#allocation154_spill] sm:$0xff] }
 0x194   : > { %v4602_v25 = vld [vmem:[#allocation139_spill] sm:$0xff] }
 0x195   : > { %1709 = vmatpush1.bf16.msra.mxu0 %v1708_v51  ;;  %1773 = vmatpush1.bf16.msra.mxu1 %v1772_v48  ;;  %v4583_v51 = vld [vmem:[#allocation114_spill] sm:$0xff]  ;;  %v4585_v48 = vld [vmem:[#allocation99_spill] sm:$0xff] }
 0x196   : > { %1711 = vmatprep.subr.bf16.mxu0 %v1710_v5  ;;  %1775 = vmatprep.subr.bf16.mxu1 %v1774_v57  ;;  %v1718_v5 = vpack.c.bf16 %v4584_v18, %v4583_v51  ;;  %v1780_v40 = vpack.c.bf16 %v4586_v15, %v4585_v48  ;;  %v4589_v57 = vld [vmem:[#allocation113_spill] sm:$0xff]  ;;  %v4596_v51 = vld [vmem:[#allocation140_spill] sm:$0xff] }
 0x197   : > { %v1720_v42 = vpack.c.bf16 %v4590_v56, %v4589_v57  ;;  %v1786_v18 = vpack.c.bf16 %v4596_v51, %v4595_v17  ;;  %v4598_v48 = vld [vmem:[#allocation137_spill] sm:$0xff]  ;;  %v4603_v56 = vld [vmem:[#allocation148_spill] sm:$0xff]  ;;  %v4608_v17 = vld [vmem:[#allocation170_spill] sm:$0xff] }
 0x198   : > { %v4610_v51 = vld [vmem:[#allocation155_spill] sm:$0xff] }
 0x199   : > { %1713 = vmatpush1.bf16.msra.mxu0 %v1712_v32  ;;  %1777 = vmatpush1.bf16.msra.mxu1 %v1776_v41  ;;  %v4591_v32 = vld [vmem:[#allocation130_spill] sm:$0xff]  ;;  %v4593_v41 = vld [vmem:[#allocation115_spill] sm:$0xff] }
 0x19a   : > { %1715 = vmatprep.subr.bf16.mxu0 %v1714_v60  ;;  %1779 = vmatprep.subr.bf16.mxu1 %v1778_v26  ;;  %v1722_v60 = vpack.c.bf16 %v4592_v34, %v4591_v32  ;;  %v1784_v1 = vpack.c.bf16 %v4594_v50, %v4593_v41  ;;  %v4597_v26 = vld [vmem:[#allocation129_spill] sm:$0xff]  ;;  %v4604_v32 = vld [vmem:[#allocation156_spill] sm:$0xff] }
 0x19b   : > { %v1724_v15 = vpack.c.bf16 %v4598_v48, %v4597_v26  ;;  %v1790_v34 = vpack.c.bf16 %v4604_v32, %v4603_v56  ;;  %v4606_v41 = vld [vmem:[#allocation153_spill] sm:$0xff]  ;;  %v4611_v48 = vld [vmem:[#allocation164_spill] sm:$0xff]  ;;  %v4616_v56 = vld [vmem:[#allocation186_spill] sm:$0xff] }
 0x19c   : > { %v4618_v32 = vld [vmem:[#allocation171_spill] sm:$0xff] }
 0x19d   : > { %1717 = vmatpush1.bf16.msra.mxu0 %v1716_v31  ;;  %1781 = vmatpush1.bf16.msra.mxu1 %v1780_v40  ;;  %v4599_v31 = vld [vmem:[#allocation146_spill] sm:$0xff]  ;;  %v4601_v40 = vld [vmem:[#allocation131_spill] sm:$0xff] }
 0x19e   : > { %1719 = vmatprep.subr.bf16.mxu0 %v1718_v5  ;;  %1783 = vmatprep.subr.bf16.mxu1 %v1782_v33  ;;  %v1726_v5 = vpack.c.bf16 %v4600_v49, %v4599_v31  ;;  %v1788_v57 = vpack.c.bf16 %v4602_v25, %v4601_v40  ;;  %v4605_v33 = vld [vmem:[#allocation145_spill] sm:$0xff]  ;;  %v4612_v31 = vld [vmem:[#allocation172_spill] sm:$0xff] }
 0x19f   : > { %v1728_v50 = vpack.c.bf16 %v4606_v41, %v4605_v33  ;;  %v1794_v49 = vpack.c.bf16 %v4612_v31, %v4611_v48  ;;  %v4614_v40 = vld [vmem:[#allocation169_spill] sm:$0xff]  ;;  %v4619_v41 = vld [vmem:[#allocation180_spill] sm:$0xff]  ;;  %v4624_v48 = vld [vmem:[#allocation202_spill] sm:$0xff] }
 0x1a0   : > { %v4626_v31 = vld [vmem:[#allocation187_spill] sm:$0xff] }
 0x1a1   : > { %1721 = vmatpush1.bf16.msra.mxu0 %v1720_v42  ;;  %1785 = vmatpush1.bf16.msra.mxu1 %v1784_v1  ;;  %v4607_v42 = vld [vmem:[#allocation162_spill] sm:$0xff]  ;;  %v4609_v1 = vld [vmem:[#allocation147_spill] sm:$0xff] }
 0x1a2   : > { %1723 = vmatprep.subr.bf16.mxu0 %v1722_v60  ;;  %1787 = vmatprep.subr.bf16.mxu1 %v1786_v18  ;;  %v1730_v60 = vpack.c.bf16 %v4608_v17, %v4607_v42  ;;  %v1792_v26 = vpack.c.bf16 %v4610_v51, %v4609_v1  ;;  %v4613_v18 = vld [vmem:[#allocation161_spill] sm:$0xff]  ;;  %v4620_v42 = vld [vmem:[#allocation188_spill] sm:$0xff] }
 0x1a3   : > { %v1732_v25 = vpack.c.bf16 %v4614_v40, %v4613_v18  ;;  %v1798_v17 = vpack.c.bf16 %v4620_v42, %v4619_v41  ;;  %v4622_v1 = vld [vmem:[#allocation185_spill] sm:$0xff]  ;;  %v4627_v40 = vld [vmem:[#allocation196_spill] sm:$0xff]  ;;  %v4633_v41 = vld [vmem:[#allocation195_spill] sm:$0xff] }
 0x1a4   : > { %v4634_v42 = vld [vmem:[#allocation203_spill] sm:$0xff] }
 0x1a5   : > { %1725 = vmatpush1.bf16.msra.mxu0 %v1724_v15  ;;  %1789 = vmatpush1.bf16.msra.mxu1 %v1788_v57  ;;  %v4615_v15 = vld [vmem:[#allocation178_spill] sm:$0xff]  ;;  %v4617_v57 = vld [vmem:[#allocation163_spill] sm:$0xff] }
 0x1a6   : > { %1727 = vmatprep.subr.bf16.mxu0 %v1726_v5  ;;  %1791 = vmatprep.subr.bf16.mxu1 %v1790_v34  ;;  %v1734_v5 = vpack.c.bf16 %v4616_v56, %v4615_v15  ;;  %v1796_v33 = vpack.c.bf16 %v4618_v32, %v4617_v57  ;;  %v4621_v34 = vld [vmem:[#allocation177_spill] sm:$0xff]  ;;  %v4628_v15 = vld [vmem:[#allocation204_spill] sm:$0xff] }
 0x1a7   : > { %v1736_v51 = vpack.c.bf16 %v4622_v1, %v4621_v34  ;;  %v1802_v56 = vpack.c.bf16 %v4628_v15, %v4627_v40  ;;  %v4630_v57 = vld [vmem:[#allocation201_spill] sm:$0xff]  ;;  %v1804_v34 = vpack.c.bf16 %v4634_v42, %v4633_v41  ;;  %v4635_v1 = vld [vmem:[#allocation212_spill] sm:$0xff] }
 0x1a8   : > { %v1289_v15 = vld [vmem:[%s1287_s15 + $0x8] sm:$0xff] }
 0x1a9   : > { %1729 = vmatpush1.bf16.msra.mxu0 %v1728_v50  ;;  %1793 = vmatpush1.bf16.msra.mxu1 %v1792_v26  ;;  %v4623_v50 = vld [vmem:[#allocation194_spill] sm:$0xff]  ;;  %v4625_v26 = vld [vmem:[#allocation179_spill] sm:$0xff] }
 0x1aa   : > { %1731 = vmatprep.subr.bf16.mxu0 %v1730_v60  ;;  %1795 = vmatprep.subr.bf16.mxu1 %v1794_v49  ;;  %v1738_v60 = vpack.c.bf16 %v4624_v48, %v4623_v50  ;;  %v1800_v18 = vpack.c.bf16 %v4626_v31, %v4625_v26  ;;  %v4629_v49 = vld [vmem:[#allocation193_spill] sm:$0xff]  ;;  %v4636_v50 = vld [vmem:[#allocation220_spill] sm:$0xff]  ;;  %v4639_v31 = vld [vmem:[#allocation211_spill] sm:$0xff] }
 0x1ab   : > { %v1740_v32 = vpack.c.bf16 %v4630_v57, %v4629_v49  ;;  %v4637_v48 = vld [vmem:[#allocation209_spill] sm:$0xff] }
 0x1ac   : > { %v4638_v26 = vld [vmem:[#allocation217_spill] sm:$0xff] }
 0x1ad   : > { %1733 = vmatpush1.bf16.msra.mxu0 %v1732_v25  ;;  %1797 = vmatpush1.bf16.msra.mxu1 %v1796_v33  ;;  %v4631_v25 = vld [vmem:[#allocation210_spill] sm:$0xff]  ;;  %v1290_v49 = vld [vmem:[%s1287_s15 + $0x10] sm:$0xff] }
 0x1ae   : > { %1735 = vmatprep.subr.bf16.mxu0 %v1734_v5  ;;  %1799 = vmatprep.subr.bf16.mxu1 %v1798_v17  ;;  %v4632_v5 = vld [vmem:[#allocation218_spill] sm:$0xff]  ;;  %v1806_v17 = vpack.c.bf16 %v4636_v50, %v4635_v1 }
 0x1af   : > { %v1742_v33 = vpack.c.bf16 %v4632_v5, %v4631_v25  ;;  %v1291_v1 = vld [vmem:[%s1287_s15 + $0x18] sm:$0xff] }
 0x1b1   : > { %1737 = vmatpush1.bf16.msra.mxu0 %v1736_v51  ;;  %1801 = vmatpush1.bf16.msra.mxu1 %v1800_v18  ;;  %v1744_v51 = vpack.c.bf16 %v4638_v26, %v4637_v48  ;;  %v1288_v18 = vld [vmem:[%s1287_s15] sm:$0xff] }
 0x1b2   : > { %1739 = vmatprep.subr.bf16.mxu0 %v1738_v60  ;;  %1803 = vmatprep.subr.bf16.mxu1 %v1802_v56  ;;  %v4640_v60 = vld [vmem:[#allocation219_spill] sm:$0xff] }
 0x1b3   : > { %v1808_v40 = vpack.c.bf16 %v4640_v60, %v4639_v31 }
 0x1b5   : > { %1741 = vmatpush1.bf16.msra.mxu0 %v1740_v32  ;;  %1805 = vmatpush1.bf16.msra.mxu1 %v1804_v34 }
 0x1b6   : > { %1743 = vmatprep.subr.bf16.mxu0 %v1742_v33  ;;  %1807 = vmatprep.subr.bf16.mxu1 %v1806_v17 }
 0x1b9   : > { %1745 = vmatpush1.bf16.msra.mxu0 %v1744_v51  ;;  %1809 = vmatpush1.bf16.msra.mxu1 %v1808_v40 }
 0x1bc   : > { %1208 = vmatmul.mubr.f32.vlgmr.msra.gmra.mrb[2].mxu0 %v1907_v39  ;;  %1279 = vmatmul.mubr.f32.vlgmr.msra.gmra.mrb[2].mxu1 %v1907_v39 }
 0x24f   : > { %v1067_v56 = vpop.f32.mrb[0].mxu0  ;;  %v1138_v25 = vpop.f32.mrb[0].mxu1 }
 0x250   : > { %v1292_v57 = vadd.f32 %v1288_v18, %v1067_v56  ;;  %v1069_v32 = vpop.f32.mrb[1].mxu0  ;;  %v1140_v33 = vpop.f32.mrb[1].mxu1  ;;  %v1294_v42 = vadd.f32 %v1290_v49, %v1138_v25 }
 0x251   : > { %v1293_v5 = vadd.f32 %v1289_v15, %v1069_v32  ;;  %v1295_v50 = vadd.f32 %v1291_v1, %v1140_v33  ;;  %v1346_v15 = vpop.permute.xlu0 %1345 }
 0x252   : > { %v1307_v41 = vmul.f32 0.5, %v1292_v57  ;;  %vm1347_vm2 = vcmp.eq.s32.totalorder %v1346_v15, 1 }
 0x253   : > { %v1311_v34 = vmul.f32 0.5, %v1293_v5  ;;  %v1316_v17 = vmul.f32 0.5, %v1295_v50  ;;  %v1299_v50 = vld [vmem:[%s1298_s21 + $0x20] sm:$0xff] }
 0x254   : > { %1853 = vtanh.f32 %v1307_v41 }
 0x255   : > { %1855 = vtanh.f32 %v1311_v34 }
 0x256   : > { %1857 = vtanh.f32 %v1294_v42 }
 0x257   : > { %1859 = vtanh.f32 %v1316_v17  ;;  %v1300_v17 = vld [vmem:[%s1298_s21 + $0x28] sm:$0xff] }
 0x25e   : > { %v1854_v48 = vpop.eup %1853 }
 0x25f   : > { %v1856_v26 = vpop.eup %1855  ;;  %v1309_v51 = vmul.f32 0.5, %v1854_v48 }
 0x260   : > { %v1858_v31 = vpop.eup %1857  ;;  %v1313_v60 = vmul.f32 0.5, %v1856_v26 }
 0x261   : > { %v1310_v40 = vadd.f32 0.5, %v1309_v51  ;;  %v1860_v25 = vpop.eup %1859 }
 0x262   : > { %v1314_v18 = vadd.f32 0.5, %v1313_v60  ;;  %v1318_v5 = vmul.f32 0.5, %v1860_v25 }
 0x263   : > { %v1321_v56 = vmul.f32 %v1858_v31, %v1310_v40 }
 0x264   : > { %v1320_v49 = vmul.f32 %v1903_v23, %v1314_v18  ;;  %v1319_v33 = vadd.f32 0.5, %v1318_v5 }
 0x266   : > { %v1322_v57 = vadd.f32 %v1321_v56, %v1320_v49  ;;  %v1302_v49 = vld [vmem:[%s1298_s21 + $0x38] sm:$0xff] }
 0x268   : > { %1861 = vtanh.f32 %v1322_v57  ;;  %v4152_v23 = vsel %vm1347_vm2, %v1322_v57, %v1903_v23  }
 0x269   : > { %v4641_v32 = vmov %v4152_v23  ;;  %v1301_v23 = vld [vmem:[%s1298_s21 + $0x30] sm:$0xff] }
 0x26a   :  { %1368 = vst [vmem:[%s4195_s9] sm:$0xff] (%p988_p0), %v4641_v32 }
 0x272   : > { %v1862_v41 = vpop.eup %1861 }
 0x273   : > { %v1324_v42 = vmul.f32 %v1862_v41, %v1319_v33 }
 0x275   : > { %v1348_v34 = vsel %vm1347_vm2, %v1324_v42, 0.0  ;;  %v1363_v1 = vsel %vm1347_vm2, %v1324_v42, %v1907_v39  }
 0x276   : > { %1352 = vst [vmem:[%s1351_s19] sm:$0xff] %v1348_v34  ;;  %1367 = vst [vmem:[%s4194_s8] sm:$0xff] (%p988_p0), %v1363_v1 }
 0x28f   : > { %v1209_v48 = vpop.f32.mrb[2].mxu0  ;;  %v1280_v31 = vpop.f32.mrb[2].mxu1 }
 0x290   : > { %v1303_v26 = vadd.f32 %v1299_v50, %v1209_v48  ;;  %v1211_v51 = vpop.f32.mrb[3].mxu0  ;;  %v1282_v40 = vpop.f32.mrb[3].mxu1  ;;  %v1305_v15 = vadd.f32 %v1301_v23, %v1280_v31 }
 0x291   : > { %v1304_v60 = vadd.f32 %v1300_v17, %v1211_v51  ;;  %v1306_v39 = vadd.f32 %v1302_v49, %v1282_v40  ;;  %v1356_v17 = vpop.permute.xlu0 %1355 }
 0x292   : > { %v1325_v18 = vmul.f32 0.5, %v1303_v26  ;;  %vm1357_vm3 = vcmp.eq.s32.totalorder %v1356_v17, 1 }
 0x293   : > { %v1329_v56 = vmul.f32 0.5, %v1304_v60  ;;  %v1334_v57 = vmul.f32 0.5, %v1306_v39  ;;  %v4645_v39 = vmov %v1363_v1 }
 0x294   : > { %1863 = vtanh.f32 %v1325_v18 }
 0x295   : > { %1865 = vtanh.f32 %v1329_v56 }
 0x296   : > { %1867 = vtanh.f32 %v1305_v15 }
 0x297   : > { %1869 = vtanh.f32 %v1334_v57 }
 0x29e   : > { %v1864_v25 = vpop.eup %1863 }
 0x29f   : > { %v1866_v5 = vpop.eup %1865  ;;  %v1327_v33 = vmul.f32 0.5, %v1864_v25 }
 0x2a0   : > { %v1868_v41 = vpop.eup %1867  ;;  %v1331_v42 = vmul.f32 0.5, %v1866_v5 }
 0x2a1   : > { %v1328_v34 = vadd.f32 0.5, %v1327_v33  ;;  %v1870_v31 = vpop.eup %1869 }
 0x2a2   : > { %v1332_v50 = vadd.f32 0.5, %v1331_v42  ;;  %v1336_v60 = vmul.f32 0.5, %v1870_v31 }
 0x2a3   : > { %v1339_v48 = vmul.f32 %v1868_v41, %v1328_v34 }
 0x2a4   : > { %v1338_v23 = vmul.f32 %v1895_v24, %v1332_v50  ;;  %v1337_v40 = vadd.f32 0.5, %v1336_v60 }
 0x2a6   : > { %v1340_v26 = vadd.f32 %v1339_v48, %v1338_v23  ;;  %v4644_v23 = vmov %v4641_v32 }
 0x2a8   : > { %1871 = vtanh.f32 %v1340_v26  ;;  %v1366_v51 = vsel %vm1357_vm3, %v1340_v26, %v1895_v24  }
 0x2a9   : > { %v4642_v24 = vmov %v1366_v51  ;;  %1421 = vst [vmem:[%s4195_s9 + $0x8] sm:$0xff] (%p988_p0), %v1366_v51 }
 0x2b0   :  { %990 = sbr.rel (!%p988_p0) target bundleno = 314 (0x13a), region = 79 }
 0x2b2   : > { %v1872_v18 = vpop.eup %1871 }
 0x2b3   : > { %v1342_v15 = vmul.f32 %v1872_v18, %v1337_v40 }
 0x2b5   : > { %v1358_v56 = vsel %vm1357_vm3, %v1342_v15, 0.0  ;;  %v1365_v49 = vsel %vm1357_vm3, %v1342_v15, %v1899_v2  }
 0x2b6   : > { %1362 = vst [vmem:[%s1361_s24 + $0x8] sm:$0xff] %v1358_v56  ;;  %v4643_v2 = vmov %v1365_v49  ;;  %1420 = vst [vmem:[%s4194_s8 + $0x8] sm:$0xff] (%p988_p0), %v1365_v49 }

</bundles_post_ra>
